<compile_context>
chip_gen: v7x
topology: tpu7x:2x2x1
jax: 0.10.0
libtpu: 0.0.40
codegen_flags: <defaults>
</compile_context>

<pallas_src>
import jax
import jax.numpy as jnp
from jax.experimental import pallas as pl
from jax.experimental.pallas import tpu as pltpu


def _round_up(x, m):
    return (x + m - 1) // m * m


# ------------------------------ Pallas kernel --------------------------------

def _conv_bn_relu_kernel(x_ref, w_ref, shift_ref, o_ref):
    """One grid step == one (batch, token-tile) output block.

    x_ref     : (1, t_tile, K_pad)      bf16  im2col patch rows for this block
    w_ref     : (K_pad, Cout_pad)       bf16  BN-folded weights (resident block)
    shift_ref : (1, Cout_pad)           f32   folded BN shift (+ conv bias)
    o_ref     : (1, t_tile, Cout_pad)         output block (lane-dense, 128-wide)
    """
    y = jnp.dot(x_ref[0], w_ref[...], preferred_element_type=jnp.float32)  # MXU
    y = y + shift_ref[...]                                                 # BN shift
    o_ref[0] = jnp.maximum(y, 0.0).astype(o_ref.dtype)                     # ReLU


# --------------------------------- wrapper ------------------------------------

def conv_bn_relu(x_nchw, w, b, bn_gamma, bn_beta, bn_mean, bn_var,
                 *, stride=1, padding=0, eps=1e-5, out_dtype=jnp.float32,
                 token_tile_cap=2048):
    """Conv2d(Cin, Cout, k, stride, padding) + BatchNorm2d(eval stats) + ReLU."""
    B, Cin, H, W = x_nchw.shape
    Cout, Cin_w, kh, kw = w.shape
    assert Cin_w == Cin
    Hp, Wp = H + 2 * padding, W + 2 * padding
    H_out = (Hp - kh) // stride + 1
    W_out = (Wp - kw) // stride + 1
    tokens = H_out * W_out

    K = kh * kw * Cin
    K_pad = _round_up(K, 256)          # 256-deep v6e/v7x MXU; 2x128 on v5e
    Cout_pad = _round_up(Cout, 128)    # lane-dense output stores

    tokens_p = _round_up(tokens, 8)    # sublane alignment
    if tokens_p <= token_tile_cap:
        t_tile = tokens_p              # whole image per batch element
    else:
        t_tile = token_tile_cap
        tokens_p = _round_up(tokens_p, t_tile)
    n_tok = tokens_p // t_tile

    # ---- host-side prep: NHWC pad + full im2col (cheap at these sizes) -------
    xp = jnp.transpose(x_nchw, (0, 2, 3, 1))                               # NHWC
    xp = jnp.pad(xp, ((0, 0), (padding, padding), (padding, padding), (0, 0)))
    slabs = []
    for dy in range(kh):
        for dx in range(kw):
            sl = jax.lax.slice(
                xp,
                (0, dy, dx, 0),
                (B, dy + (H_out - 1) * stride + 1,
                 dx + (W_out - 1) * stride + 1, Cin),
                (1, stride, stride, 1))
            slabs.append(sl)                                               # (B,Ho,Wo,Cin)
    patches = jnp.concatenate(slabs, axis=-1).reshape(B, tokens, K)        # (dy,dx,ci)
    patches = jnp.pad(patches, ((0, 0), (0, tokens_p - tokens), (0, K_pad - K)))
    patches = patches.astype(jnp.bfloat16)

    # Fold BN scale into the weights; fold BN shift and conv bias into one shift.
    scale = bn_gamma / jnp.sqrt(bn_var + eps)                              # (Cout,)
    w_folded = w * scale[:, None, None, None]                              # (Cout,Cin,kh,kw)
    w_mat = jnp.transpose(w_folded, (2, 3, 1, 0)).reshape(K, Cout)         # (dy,dx,ci) rows
    w_mat = jnp.pad(w_mat, ((0, K_pad - K), (0, Cout_pad - Cout))).astype(jnp.bfloat16)
    shift = (b - bn_mean) * scale + bn_beta
    shift = jnp.pad(shift, (0, Cout_pad - Cout)).reshape(1, Cout_pad).astype(jnp.float32)

    grid = (B, n_tok)   # both parallel: no reduction axis, v7x megacore gets >=2 steps
    out_tok = pl.pallas_call(
        _conv_bn_relu_kernel,
        grid=grid,
        in_specs=[
            pl.BlockSpec((1, t_tile, K_pad), lambda bb, t: (bb, t, 0)),
            # whole folded weight, resident across all grid steps
            pl.BlockSpec((K_pad, Cout_pad), lambda bb, t: (0, 0)),
            pl.BlockSpec((1, Cout_pad), lambda bb, t: (0, 0)),
        ],
        out_specs=pl.BlockSpec((1, t_tile, Cout_pad), lambda bb, t: (bb, t, 0)),
        out_shape=jax.ShapeDtypeStruct((B, tokens_p, Cout_pad), out_dtype),
        compiler_params=pltpu.CompilerParams(
            dimension_semantics=("parallel", "parallel")),
    )(patches, w_mat, shift)

    out = out_tok[:, :tokens, :Cout].reshape(B, H_out, W_out, Cout)
    return jnp.transpose(out, (0, 3, 1, 2)).astype(jnp.float32)            # NCHW


# ------------------------------ f32 reference ---------------------------------

def _reference(x, w, b, gamma, beta, mean, var, *, stride, padding, eps=1e-5):
    y = jax.lax.conv_general_dilated(
        x, w, window_strides=(stride, stride),
        padding=((padding, padding), (padding, padding)),
        dimension_numbers=("NCHW", "OIHW", "NCHW"))
    y = y + b[None, :, None, None]
    y = (y - mean[None, :, None, None]) \
        * (gamma / jnp.sqrt(var + eps))[None, :, None, None] \
        + beta[None, :, None, None]
    return jnp.maximum(y, 0.0)


# ----------------------------------- main --------------------------------------

if __name__ == "__main__":
    # ConvBNReLU(in_channel=64, out_channel=128, kernel_size=3, stride=1, padding=1)
    B, Cin, Cout, H, W = 2, 64, 128, 16, 16
    ksize, stride, padding = 3, 1, 1

    key = jax.random.PRNGKey(0)
    kx, kwt, kb, kg, kbe, km, kv = jax.random.split(key, 7)
    x = jax.random.normal(kx, (B, Cin, H, W), jnp.float32)
    w = 0.05 * jax.random.normal(kwt, (Cout, Cin, ksize, ksize), jnp.float32)
    b = 0.1 * jax.random.normal(kb, (Cout,), jnp.float32)
    gamma = 1.0 + 0.1 * jax.random.normal(kg, (Cout,), jnp.float32)
    beta = 0.1 * jax.random.normal(kbe, (Cout,), jnp.float32)
    mean = 0.1 * jax.random.normal(km, (Cout,), jnp.float32)
    var = 1.0 + 0.1 * jnp.abs(jax.random.normal(kv, (Cout,), jnp.float32))

    out = conv_bn_relu(x, w, b, gamma, beta, mean, var,
                       stride=stride, padding=padding)
    out = jax.block_until_ready(out)

    assert out.shape == (B, Cout, H, W), out.shape
    assert bool(jnp.all(jnp.isfinite(out)))

    ref = _reference(x, w, b, gamma, beta, mean, var,
                     stride=stride, padding=padding)
    err = jnp.abs(out - ref)
    tol = 5e-2 + 1.5e-2 * jnp.abs(ref)      # atol + rtol (bf16 operands, f32 accum)
    max_err = float(jnp.max(err))
    assert bool(jnp.all(err <= tol)), f"max abs error vs f32 reference: {max_err}"
    print("KERNEL_OK")
</pallas_src>

<mosaic_0001>
module attributes {stable_mosaic.version = 11 : i64} {
  func.func @_conv_bn_relu_kernel(%arg0: i32, %arg1: i32, %arg2: memref<1x256x768xbf16, #tpu.memory_space<vmem>>, %arg3: memref<768x128xbf16, #tpu.memory_space<vmem>>, %arg4: memref<1x128xf32, #tpu.memory_space<vmem>>, %arg5: memref<1x256x128xf32, #tpu.memory_space<vmem>>) attributes {dimension_semantics = [#tpu.dimension_semantics<parallel>, #tpu.dimension_semantics<parallel>], iteration_bounds = array<i64: 2, 1>, scalar_prefetch = 0 : i64, scratch_operands = 0 : i64, tpu.core_type = #tpu.core_type<tc>, window_params = [{transform_indices = @transform_0, window_bounds = array<i64: 1, 256, 768>}, {pipeline_mode = #tpu.pipeline_mode<synchronous>, transform_indices = @transform_1, window_bounds = array<i64: 768, 128>}, {pipeline_mode = #tpu.pipeline_mode<synchronous>, transform_indices = @transform_2, window_bounds = array<i64: 1, 128>}, {transform_indices = @transform_3, window_bounds = array<i64: 1, 256, 128>}]} {
    %c0 = arith.constant 0 : index
    %c0_0 = arith.constant 0 : index
    %c0_1 = arith.constant 0 : index
    %0 = vector.load %arg2[%c0, %c0_0, %c0_1] : memref<1x256x768xbf16, #tpu.memory_space<vmem>>, vector<1x256x768xbf16>
    %1 = vector.shape_cast %0 : vector<1x256x768xbf16> to vector<256x768xbf16>
    %c0_2 = arith.constant 0 : index
    %c0_3 = arith.constant 0 : index
    %2 = vector.load %arg3[%c0_2, %c0_3] : memref<768x128xbf16, #tpu.memory_space<vmem>>, vector<768x128xbf16>
    %cst = arith.constant dense<0.000000e+00> : vector<256x128xf32>
    %3 = tpu.matmul %1, %2, %cst {dimension_numbers = #tpu.dot_dimension_numbers<[1], [0], [0], [1], [0, 0, 1, 1], [], []>} : vector<256x768xbf16>, vector<768x128xbf16>, vector<256x128xf32> -> vector<256x128xf32>
    %c0_4 = arith.constant 0 : index
    %c0_5 = arith.constant 0 : index
    %4 = vector.load %arg4[%c0_4, %c0_5] : memref<1x128xf32, #tpu.memory_space<vmem>>, vector<1x128xf32>
    %5 = vector.broadcast %4 : vector<1x128xf32> to vector<256x128xf32>
    %6 = arith.addf %3, %5 : vector<256x128xf32>
    %cst_6 = arith.constant 0.000000e+00 : f32
    %7 = vector.broadcast %cst_6 : f32 to vector<256x128xf32>
    %8 = arith.maximumf %6, %7 : vector<256x128xf32>
    %c0_7 = arith.constant 0 : index
    %c0_8 = arith.constant 0 : index
    %c0_9 = arith.constant 0 : index
    %9 = vector.load %arg5[%c0_7, %c0_8, %c0_9] : memref<1x256x128xf32, #tpu.memory_space<vmem>>, vector<1x256x128xf32>
    %10 = vector.shape_cast %9 : vector<1x256x128xf32> to vector<256x128xf32>
    %11 = vector.shape_cast %8 : vector<256x128xf32> to vector<1x256x128xf32>
    tpu.vector_store %arg5[%c0_7, %c0_8, %c0_9], %11 {strides = array<i32>} : memref<1x256x128xf32, #tpu.memory_space<vmem>>, vector<1x256x128xf32>,
    return
  }
  func.func @transform_0(%arg0: i32, %arg1: i32) -> (i32, i32, i32) {
    %c0_i32 = arith.constant 0 : i32
    %c0_i32_0 = arith.constant 0 : i32
    return %arg0, %arg1, %c0_i32 : i32, i32, i32
  }
  func.func @transform_1(%arg0: i32, %arg1: i32) -> (i32, i32) {
    %c0_i32 = arith.constant 0 : i32
    %c0_i32_0 = arith.constant 0 : i32
    %c0_i32_1 = arith.constant 0 : i32
    return %c0_i32, %c0_i32_0 : i32, i32
  }
  func.func @transform_2(%arg0: i32, %arg1: i32) -> (i32, i32) {
    %c0_i32 = arith.constant 0 : i32
    %c0_i32_0 = arith.constant 0 : i32
    %c0_i32_1 = arith.constant 0 : i32
    return %c0_i32, %c0_i32_0 : i32, i32
  }
  func.func @transform_3(%arg0: i32, %arg1: i32) -> (i32, i32, i32) {
    %c0_i32 = arith.constant 0 : i32
    %c0_i32_0 = arith.constant 0 : i32
    return %arg0, %arg1, %c0_i32 : i32, i32, i32
  }
}

</mosaic_0001>

<bundles_post_ra>
// kernel: tpu_custom_call.1
= control target key start
LH: loop header
LB: loop body
LE: loop exit
PB: predicated region body
PF: predicated region fallthrough
CT: control target
= control target key end

     0   :  { %8 = vsyncpa [#allocation3], 0  ;;  %s3294_s0 = inlined_call_operand.hbm [shape: bf16[2,256,768], index: 0, kind: input, shape index: {}]   ;;  %s3295_s1 = inlined_call_operand.hbm [shape: bf16[768,128], index: 1, kind: input, shape index: {}]   ;;  %s3296_s2 = inlined_call_operand.vmem [shape: f32[1,128], index: 2, kind: input, shape index: {}]   ;;  %s3297_s3 = inlined_call_operand.hbm [shape: f32[2,256,128], index: 3, kind: output, shape index: {}]  }
   0x1   :  { %10 = vsyncpa [#allocation3 + $0x1], 0 }
   0x2   :  { %11 = vsyncpa [#allocation6], 0 }
   0x3   :  { %12 = vsyncpa [#allocation4], 0 }
   0x4   :  { %14 = vsyncpa [#allocation4 + $0x1], 0  ;;  %s2814_s12 = smov 0   ;;  %s2816_s13 = smov 0  }
   0x5   :  { %s2818_s14 = smov 0   ;;  %s2820_s15 = smov 0  }
   0x6   :  { %s2822_s16 = smov 0   ;;  %s2824_s17 = smov 0  }
   0x7 LB: > { %s1853_s18 = sadd.s32 4294967295, %s2783_s17   ;;  %s1854_s19 = sadd.s32 4294967294, %s2783_s17   ;;  %s2783_s17 = sphi %s2824_s17, %s20_s17   ;;  %s2779_s16 = sphi %s2822_s16, %s3320_s16   ;;  %s2775_s15 = sphi %s2820_s15, %s3319_s15   ;;  %s2771_s14 = sphi %s2818_s14, %s3318_s14   ;;  %s2767_s13 = sphi %s2816_s13, %s3317_s13   ;;  %s2763_s12 = sphi %s2814_s12, %s3316_s12  }
   0x8   : > { %p54_p0 = scmp.ne.s32.totalorder %s2767_s13, %s2763_s12  ;;  %p2848_p1 = scmp.eq.s32.totalorder %s1853_s18, 0 }
   0x9   : > { %p2852_p2 = scmp.eq.s32.totalorder %s1853_s18, 1  ;;  %p128_p3 = scmp.eq.s32.totalorder %s1854_s19, 1 }
   0xa   : > { %s3302_s20 = scalar_select %p2848_p1, 1, 0 }
   0xb   : > { %s3303_s21 = scalar_select %p2852_p2, 1, 0 }
   0xc   : > { %p2858_p4 = por %p2848_p1, %p54_p0  ;;  %p1855_p5 = scmp.ge.s32.totalorder %s2783_s17, 1 }
   0xd   : > { %p2863_p6 = por %p128_p3, %p54_p0  ;;  %p135_p7 = scmp.lt.s32.totalorder %s2783_s17, 3 }
   0xe   : > { %s3304_s22 = scalar_select %p2858_p4, 1, 0 }
   0xf   : > { %s3305_s23 = scalar_select %p2863_p6, 1, 0 }
  0x10   : > { %p2868_p8 = pnand %p1855_p5, %p135_p7  ;;  %s2785_s25 = smov [#allocation5]  }
  0x11   : > { %s147_s26 = sshll.u32 %s2785_s25, 4  ;;  %s32_s28 = sadd.s32 1, %s2779_s16  ;;  %s148_s26 = int_to_ptr.vmem [resolvable:$true] %s147_s26 }
  0x12   : > { %s3306_s24 = scalar_select %p2868_p8, 1, 0 }
  0x13   : > { %p2376_p9 = pneg %p2868_p8  ;;  %s2639_s4 = scalar_lea.hbm %s3295_s1, 6144 }
  0x14   : > { %p2640_p12 = scmp.ne.s32.totalorder %s3295_s1, %s2639_s4  ;;  %p2646_p5 = scmp.lt.u32.totalorder %s2639_s4, %s3295_s1 }
  0x15   : > { %p2877_p11 = pnand %p2376_p9, %p2848_p1 }
  0x17   : > { %p2641_p13 = pneg %p2877_p11 }
  0x19   : > { %p2642_p0 = pnand %p2641_p13, %p2640_p12 }
  0x1b   : > { %p2643_p3 = pneg %p2642_p0 }
  0x1d   : > { %p2648_p7 = pnand %p2646_p5, %p2643_p3 }
  0x1f   : > { %2651 = shalt.err (!%p2648_p7)
}
  0x20   : > { %s2652_s9 = scalar_lea.vmem %s148_s26, 6144  ;;  %p2660_p1 = scmp.lt.s32.totalorder %s148_s26, %s148_s26 }
  0x21   : > { %p2653_p9 = scmp.ne.s32.totalorder %s148_s26, %s2652_s9  ;;  %p2661_p4 = scmp.lt.s32.totalorder %s2652_s9, %s2652_s9 }
  0x23   : > { %p2655_p10 = pnand %p2653_p9, %p2641_p13  ;;  %p2662_p8 = por %p2661_p4, %p2660_p1 }
  0x25   : > { %p2656_p6 = pneg %p2655_p10 }
  0x27   : > { %p2663_p2 = pnand %p2662_p8, %p2656_p6 }
  0x29   : > { %2666 = shalt.err (!%p2663_p2)
}
  0x2a   : > { %s2786_s10 = smov 64   ;;  %s2787_s11 = smov 4  }
  0x2b   : > { %2379 = dma.hbm_to_vmem [thread:$0]  (!%p2877_p11), %s3295_s1, 6144, %s148_s26, [#allocation6], %s2786_s10, %s2786_s10, %s2787_s11  }
  0x2c   : > { %p34_p1 = scmp.ge.s32.totalorder %s32_s28, 2  ;;  %s41_s25 = sadd.s32 1, %s2771_s14 }
  0x2d   : > { %p48_p2 = scmp.ne.s32.totalorder %s2771_s14, %s2767_s13  ;;  %p49_p4 = scmp.eq.s32.totalorder %s2783_s17, 0 }
  0x2e   : > { %s3322_s28 = smov (%p34_p1, %s32_s28), 0  ;;  %p3308_p8 = scmp.ne.s32.totalorder %s3303_s21, 0 }
  0x2f   : > { %p50_p6 = por %p49_p4, %p48_p2  ;;  %s36_s30 = ssub.s32 %s2779_s16, %s3322_s28 }
  0x30   : > { %p2906_p10 = por %p3308_p8, %p48_p2  ;;  %p2389_p12 = scmp.lt.s32.totalorder %s2783_s17, 2 }
  0x31   : > { %p39_p13 = scmp.eq.s32.totalorder %s36_s30, 0  ;;  %s164_s27 = sand.u32 1, %s2771_s14  }
  0x32   : > { %s2365_s4 = smul.u32 768, %s164_s27  ;;  %p2918_p11 = pnand %p2389_p12, %p50_p6 }
  0x33   : > { %s2915_s5 = scalar_select %p39_p13, %s2771_s14, %s41_s25  }
  0x34   : > { %s2366_s26 = smul.u32 12288, %s2779_s16  ;;  %s168_s6 = scalar_lea.vmem [#allocation2], %s2365_s4 }
  0x35   : > { %s178_s7 = sshll.u32 %s168_s6, 4  ;;  %s2929_s11 = scalar_lea.sflag [#allocation3], %s164_s27  ;;  %s2927_s7 = int_to_ptr.vmem [resolvable:$true] %s178_s7 }
  0x36   : > { %s2925_s10 = scalar_lea.hbm %s3294_s0, %s2366_s26  ;;  %p2669_p3 = pneg %p2918_p11 }
  0x37   : > { %s2667_s18 = scalar_lea.hbm %s2925_s10, 12288  ;;  %s2672_s30 = scalar_lea.hbm %s3294_s0, 24576 }
  0x38   : > { %p2668_p0 = scmp.ne.s32.totalorder %s2925_s10, %s2667_s18  ;;  %p2673_p9 = scmp.lt.u32.totalorder %s2925_s10, %s3294_s0 }
  0x39   : > { %p2674_p1 = scmp.lt.u32.totalorder %s2672_s30, %s2667_s18  ;;  %p2676_p4 = scmp.lt.u32.totalorder %s2667_s18, %s2925_s10 }
  0x3a   : > { %p2670_p5 = pnand %p2669_p3, %p2668_p0 }
  0x3b   : > { %p2675_p2 = por %p2674_p1, %p2673_p9 }
  0x3c   : > { %p2671_p7 = pneg %p2670_p5 }
  0x3d   : > { %p2677_p6 = por %p2676_p4, %p2675_p2 }
  0x3f   : > { %p2678_p8 = pnand %p2677_p6, %p2671_p7 }
  0x41   : > { %2681 = shalt.err (!%p2678_p8)
}
  0x42   : > { %s2682_s27 = scalar_lea.vmem %s2927_s7, 12288  ;;  %s2788_s6 = smov [#allocation2]  }
  0x43   : > { %p2683_p12 = scmp.ne.s32.totalorder %s2927_s7, %s2682_s27  ;;  %s2687_s9 = sshll.u32 %s2788_s6, 4  ;;  %s2688_s9 = int_to_ptr.vmem [resolvable:$false] %s2687_s9 }
  0x44   : > { %s2689_s21 = scalar_lea.vmem %s2688_s9, 24576  ;;  %p2690_p5 = scmp.lt.s32.totalorder %s2927_s7, %s2688_s9 }
  0x45   : > { %p2685_p13 = pnand %p2683_p12, %p2669_p3  ;;  %p2691_p9 = scmp.lt.s32.totalorder %s2689_s21, %s2682_s27 }
  0x47   : > { %p2686_p0 = pneg %p2685_p13  ;;  %p2692_p1 = por %p2691_p9, %p2690_p5 }
  0x49   : > { %p2693_p2 = pnand %p2692_p1, %p2686_p0 }
  0x4b   : > { %2696 = shalt.err (!%p2693_p2)
}
  0x4c   : > { %s2789_s18 = smov 384   ;;  %s2790_s19 = smov 24  }
  0x4d   : > { %2383 = dma.hbm_to_vmem [thread:$0]  (!%p2918_p11), %s2925_s10, 12288, %s2927_s7, %s2929_s11, %s2789_s18, %s2789_s18, %s2790_s19  }
  0x4e   : > { %p3311_p3 = scmp.ne.s32.totalorder %s3306_s24, 0 }
  0x4f   : > { %s2960_s25 = sand.u32 (!%p3311_p3), 1, %s2767_s13   ;;  %p3312_p7 = scmp.ne.s32.totalorder (!%p3311_p3), %s3304_s22, 0 }
  0x50   : > { %190 = sbr.rel (%p3311_p3) target bundleno = 546 (0x222), region = 32  ;;  %s193_s4 = scalar_lea.sflag (!%p3311_p3), [#allocation3], %s2960_s25 }
  0x51   : > { %s2367_s30 = smul.u32 (!%p3311_p3), 768, %s2960_s25 }
  0x53   : > { %s2964_s26 = scalar_lea.vmem (!%p3311_p3), [#allocation2], %s2367_s30 }
  0x57   : > { %2750 = dma.done.wait (%p3312_p7), %s193_s4, 12288  }
  0x58   : > { %2752 = vsyncadd (%p3312_p7), %s193_s4, 4294955008  ;;  %p3313_p11 = scmp.ne.s32.totalorder %s3302_s20, 0 }
  0x5a   : > { %2754 = dma.done.wait (%p3313_p11), [#allocation6], 6144  }
  0x5b   : > { %2756 = vsyncadd (%p3313_p11), [#allocation6], 4294961152  ;;  %v2447_v0 = vld [vmem:[#allocation5 + $0x40] sm:$0xff]   ;;  %v2449_v2 = vld [vmem:[#allocation5 + $0x48] sm:$0xff]   ;;  %s1861_s24 = sshll.u32 %s2960_s25, 8  ;;  %s2012_s8 = sshll.u32 %s2775_s15, 12 }
  0x5c   : > { %v2448_v1 = vld [vmem:[#allocation5] sm:$0xff]   ;;  %2013 = vmatprep.subr.bf16.mxu0 %v2447_v0  ;;  %2349 = vmatprep.subr.bf16.mxu1 %v2447_v0  ;;  %v2450_v3 = vld [vmem:[#allocation5 + $0x8] sm:$0xff]   ;;  %v2451_v4 = vld [vmem:[#allocation5 + $0x50] sm:$0xff]   ;;  %s3162_s7 = scalar_lea.vmem [#allocation7], %s1861_s24  ;;  %s3241_s6 = scalar_lea.hbm %s3297_s3, %s2012_s8 }
  0x5d   : > { %2014 = vmatpush3.bf16.msra.mxu0 %v2448_v1  ;;  %2357 = vmatpush3.bf16.msra.mxu1 %v2448_v1  ;;  %v2452_v5 = vld [vmem:[#allocation5 + $0x10] sm:$0xff]   ;;  %v2453_v6 = vld [vmem:[#allocation5 + $0x58] sm:$0xff]   ;;  %v2455_v8 = vld [vmem:[#allocation5 + $0x60] sm:$0xff]   ;;  %s1756_s10 = sshll.u32 %s3162_s7, 4  ;;  %s1741_s9 = scalar_lea.sflag [#allocation4], %s2960_s25  ;;  %s3243_s10 = int_to_ptr.vmem [resolvable:$true] %s1756_s10 }
  0x5e   : > { %2015 = vmatprep.subr.bf16.mxu0 %v2449_v2  ;;  %2350 = vmatprep.subr.bf16.mxu1 %v2449_v2  ;;  %v2454_v7 = vld [vmem:[#allocation5 + $0x18] sm:$0xff]   ;;  %v2456_v9 = vld [vmem:[#allocation5 + $0x20] sm:$0xff]   ;;  %v2457_v10 = vld [vmem:[#allocation5 + $0x68] sm:$0xff]   ;;  %s2697_s21 = scalar_lea.vmem %s3243_s10, 4096  ;;  %s2791_s15 = smov [#allocation7]  }
  0x5f   : > { %v2465_v11 = vld [vmem:[%s2964_s26 + $0x4] ss:$24 sps:$4 sm:$0xff]   ;;  %v2458_v13 = vld [vmem:[#allocation5 + $0x28] sm:$0xff]   ;;  %v2459_v14 = vld [vmem:[#allocation5 + $0x70] sm:$0xff]   ;;  %p2698_p4 = scmp.ne.s32.totalorder %s3243_s10, %s2697_s21  ;;  %s2701_s18 = sshll.u32 %s2791_s15, 4  ;;  %s2702_s18 = int_to_ptr.vmem [resolvable:$false] %s2701_s18 }
  0x60   : > { %v2468_v12 = vld [vmem:[%s2964_s26 + $0x184] ss:$24 sps:$4 sm:$0xff]   ;;  %1225 = vmatprep.mubr.bf16.mxu0 %v2465_v11  ;;  %v2460_v15 = vld [vmem:[#allocation5 + $0x30] sm:$0xff]   ;;  %v2463_v19 = vld [vmem:[%s2964_s26] ss:$24 sps:$4 sm:$0xff]   ;;  %s2703_s19 = scalar_lea.vmem %s2702_s18, 8192  ;;  %p2704_p12 = scmp.lt.s32.totalorder %s3243_s10, %s2702_s18 }
  0x61   : > { %2016 = vmatpush3.bf16.msra.mxu0 %v2450_v3  ;;  %2358 = vmatpush3.bf16.msra.mxu1 %v2450_v3  ;;  %v2461_v16 = vld [vmem:[#allocation5 + $0x78] sm:$0xff]   ;;  %v2469_v18 = vld [vmem:[#allocation5 + $0xc0] sm:$0xff]   ;;  %v2473_v24 = vld [vmem:[%s2964_s26 + $0x34] ss:$24 sps:$4 sm:$0xff]   ;;  %p2699_p6 = pnand %p2698_p4, %p2906_p10  ;;  %p2705_p13 = scmp.lt.s32.totalorder %s2703_s19, %s2697_s21 }
  0x62   : > { %2017 = vmatprep.subr.bf16.mxu0 %v2451_v4  ;;  %2351 = vmatprep.subr.bf16.mxu1 %v2451_v4  ;;  %v2462_v17 = vld [vmem:[#allocation5 + $0x38] sm:$0xff]   ;;  %v2471_v20 = vld [vmem:[#allocation5 + $0x140] sm:$0xff]   ;;  %v2475_v25 = vld [vmem:[%s2964_s26 + $0x1b4] ss:$24 sps:$4 sm:$0xff]  }
  0x63   : > { %1289 = vmatprep.mubr.bf16.mxu1 %v2468_v12  ;;  %v2466_v21 = vld [vmem:[%s2964_s26 + $0x180] ss:$24 sps:$4 sm:$0xff]   ;;  %v2479_v26 = vld [vmem:[#allocation5 + $0xc8] sm:$0xff]   ;;  %v2489_v30 = vld [vmem:[#allocation5 + $0xd0] sm:$0xff]   ;;  %p2700_p8 = pneg %p2699_p6  ;;  %p2706_p0 = por %p2705_p13, %p2704_p12 }
  0x64   : > { %v2470_v22 = vld [vmem:[#allocation5 + $0x80] sm:$0xff]   ;;  %v2480_v27 = vld [vmem:[#allocation5 + $0x88] sm:$0xff]   ;;  %v2491_v33 = vld [vmem:[#allocation5 + $0x150] sm:$0xff]  }
  0x65   : > { %2018 = vmatpush3.bf16.msra.mxu0 %v2452_v5  ;;  %2359 = vmatpush3.bf16.msra.mxu1 %v2452_v5  ;;  %v2472_v23 = vld [vmem:[#allocation5 + $0x100] sm:$0xff]   ;;  %v2481_v28 = vld [vmem:[#allocation5 + $0x148] sm:$0xff]   ;;  %v2490_v36 = vld [vmem:[#allocation5 + $0x90] sm:$0xff]   ;;  %p2707_p5 = pnand %p2706_p0, %p2700_p8 }
  0x66   : > { %2019 = vmatprep.subr.bf16.mxu0 %v2453_v6  ;;  %2352 = vmatprep.subr.bf16.mxu1 %v2453_v6  ;;  %v2482_v29 = vld [vmem:[#allocation5 + $0x108] sm:$0xff]   ;;  %v2483_v34 = vld [vmem:[%s2964_s26 + $0x64] ss:$24 sps:$4 sm:$0xff]   ;;  %v2492_v37 = vld [vmem:[#allocation5 + $0x110] sm:$0xff]  }
  0x67   : > { %v2477_v31 = vld [vmem:[%s2964_s26 + $0x30] ss:$24 sps:$4 sm:$0xff]   ;;  %v2485_v35 = vld [vmem:[%s2964_s26 + $0x1e4] ss:$24 sps:$4 sm:$0xff]   ;;  %v2487_v40 = vld [vmem:[%s2964_s26 + $0x60] ss:$24 sps:$4 sm:$0xff]  }
  0x68   : > { %v2478_v32 = vld [vmem:[%s2964_s26 + $0x1b0] ss:$24 sps:$4 sm:$0xff]   ;;  %v2499_v38 = vld [vmem:[#allocation5 + $0xd8] sm:$0xff]   ;;  %v2493_v44 = vld [vmem:[%s2964_s26 + $0x94] ss:$24 sps:$4 sm:$0xff]  }
  0x69   : > { %2020 = vmatpush3.bf16.msra.mxu0 %v2454_v7  ;;  %2360 = vmatpush3.bf16.msra.mxu1 %v2454_v7  ;;  %v2501_v39 = vld [vmem:[#allocation5 + $0x158] sm:$0xff]   ;;  %v2495_v45 = vld [vmem:[%s2964_s26 + $0x214] ss:$24 sps:$4 sm:$0xff]   ;;  %v2509_v46 = vld [vmem:[#allocation5 + $0xe0] sm:$0xff]  }
  0x6a   : > { %2021 = vmatprep.subr.bf16.mxu0 %v2455_v8  ;;  %2353 = vmatprep.subr.bf16.mxu1 %v2455_v8  ;;  %v2488_v41 = vld [vmem:[%s2964_s26 + $0x1e0] ss:$24 sps:$4 sm:$0xff]   ;;  %v2497_v50 = vld [vmem:[%s2964_s26 + $0x90] ss:$24 sps:$4 sm:$0xff]   ;;  %v2503_v53 = vld [vmem:[%s2964_s26 + $0xc4] ss:$24 sps:$4 sm:$0xff]  }
  0x6b   : > { %v2500_v42 = vld [vmem:[#allocation5 + $0x98] sm:$0xff]   ;;  %v2510_v47 = vld [vmem:[#allocation5 + $0xa0] sm:$0xff]   ;;  %v2498_v51 = vld [vmem:[%s2964_s26 + $0x210] ss:$24 sps:$4 sm:$0xff]  }
  0x6c   : > { %v2502_v43 = vld [vmem:[#allocation5 + $0x118] sm:$0xff]   ;;  %v2511_v48 = vld [vmem:[#allocation5 + $0x160] sm:$0xff]   ;;  %v2519_v52 = vld [vmem:[#allocation5 + $0xe8] sm:$0xff]  }
  0x6d   : > { %2022 = vmatpush3.bf16.msra.mxu0 %v2456_v9  ;;  %2361 = vmatpush3.bf16.msra.mxu1 %v2456_v9  ;;  %v2512_v49 = vld [vmem:[#allocation5 + $0x120] sm:$0xff]   ;;  %v2520_v55 = vld [vmem:[#allocation5 + $0xa8] sm:$0xff]   ;;  %v2529_v58 = vld [vmem:[#allocation5 + $0xf0] sm:$0xff]  }
  0x6e   : > { %2023 = vmatprep.subr.bf16.mxu0 %v2457_v10  ;;  %2354 = vmatprep.subr.bf16.mxu1 %v2457_v10  ;;  %v2505_v54 = vld [vmem:[%s2964_s26 + $0x244] ss:$24 sps:$4 sm:$0xff]   ;;  %v2521_v56 = vld [vmem:[#allocation5 + $0x168] sm:$0xff]   ;;  %v2507_v59 = vld [vmem:[%s2964_s26 + $0xc0] ss:$24 sps:$4 sm:$0xff]  }
  0x6f   : > { %v2522_v57 = vld [vmem:[#allocation5 + $0x128] sm:$0xff]   ;;  %v2508_v60 = vld [vmem:[%s2964_s26 + $0x240] ss:$24 sps:$4 sm:$0xff]   ;;  %v2530_v61 = vld [vmem:[#allocation5 + $0xb0] sm:$0xff]  }
  0x70   : > { %v2513_v62 = vld [vmem:[%s2964_s26 + $0xf4] ss:$24 sps:$4 sm:$0xff]   ;;  %v2539_v2 = vld [vmem:[#allocation5 + $0xf8] sm:$0xff]   ;;  %v2517_v6 = vld [vmem:[%s2964_s26 + $0xf0] ss:$24 sps:$4 sm:$0xff]  }
  0x71   : > { %2024 = vmatpush3.bf16.msra.mxu0 %v2458_v13  ;;  %2362 = vmatpush3.bf16.msra.mxu1 %v2458_v13  ;;  %v2531_v63 = vld [vmem:[#allocation5 + $0x170] sm:$0xff]   ;;  %v2540_v3 = vld [vmem:[#allocation5 + $0xb8] sm:$0xff]  }
  0x72   : > { %2025 = vmatprep.subr.bf16.mxu0 %v2459_v14  ;;  %2355 = vmatprep.subr.bf16.mxu1 %v2459_v14  ;;  %v2532_v0 = vld [vmem:[#allocation5 + $0x130] sm:$0xff]   ;;  %v2541_v4 = vld [vmem:[#allocation5 + $0x178] sm:$0xff]  }
  0x73   : > { %v2515_v1 = vld [vmem:[%s2964_s26 + $0x274] ss:$24 sps:$4 sm:$0xff]   ;;  %v2542_v5 = vld [vmem:[#allocation5 + $0x138] sm:$0xff]   ;;  %v2518_v7 = vld [vmem:[%s2964_s26 + $0x270] ss:$24 sps:$4 sm:$0xff]  }
  0x74   : > { %v2523_v8 = vld [vmem:[%s2964_s26 + $0x124] ss:$24 sps:$4 sm:$0xff]   ;;  %v2527_v10 = vld [vmem:[%s2964_s26 + $0x120] ss:$24 sps:$4 sm:$0xff]   ;;  %v2533_v12 = vld [vmem:[%s2964_s26 + $0x154] ss:$24 sps:$4 sm:$0xff]  }
  0x75   : > { %2026 = vmatpush3.bf16.msra.mxu0 %v2460_v15  ;;  %2363 = vmatpush3.bf16.msra.mxu1 %v2460_v15  ;;  %v2525_v9 = vld [vmem:[%s2964_s26 + $0x2a4] ss:$24 sps:$4 sm:$0xff]   ;;  %v2528_v11 = vld [vmem:[%s2964_s26 + $0x2a0] ss:$24 sps:$4 sm:$0xff]   ;;  %v2535_v13 = vld [vmem:[%s2964_s26 + $0x2d4] ss:$24 sps:$4 sm:$0xff]  }
  0x76   : > { %2027 = vmatprep.subr.bf16.mxu0 %v2461_v16  ;;  %2356 = vmatprep.subr.bf16.mxu1 %v2461_v16  ;;  %v2537_v14 = vld [vmem:[%s2964_s26 + $0x150] ss:$24 sps:$4 sm:$0xff]   ;;  %v2545_v16 = vld [vmem:[%s2964_s26 + $0xc] ss:$24 sps:$4 sm:$0xff]  }
  0x77   : > { %v2538_v15 = vld [vmem:[%s2964_s26 + $0x2d0] ss:$24 sps:$4 sm:$0xff]  }
  0x79   : > { %2028 = vmatpush3.bf16.msra.mxu0 %v2462_v17  ;;  %2364 = vmatpush3.bf16.msra.mxu1 %v2462_v17  ;;  %v2548_v17 = vld [vmem:[%s2964_s26 + $0x14] ss:$24 sps:$4 sm:$0xff]  }
  0x7a   : > { %2125 = vmatprep.subr.bf16.mxu1 %v2469_v18  ;;  %2237 = vmatprep.subr.bf16.mxu0 %v2471_v20  ;;  %v2543_v18 = vld [vmem:[%s2964_s26 + $0x8] ss:$24 sps:$4 sm:$0xff]   ;;  %v2549_v20 = vld [vmem:[%s2964_s26 + $0x3c] ss:$24 sps:$4 sm:$0xff]  }
  0x7c   : > { %1226 = vmatmul.mubr.bf16.vlgmr.msra.gmra.mrb[0].mxu0 %v2463_v19  ;;  %1290 = vmatmul.mubr.bf16.vlgmr.msra.gmra.mrb[0].mxu1 %v2466_v21  ;;  %v2546_v19 = vld [vmem:[%s2964_s26 + $0x10] ss:$24 sps:$4 sm:$0xff]   ;;  %v2551_v21 = vld [vmem:[%s2964_s26 + $0x44] ss:$24 sps:$4 sm:$0xff]  }
  0x7d   : > { %2126 = vmatpush3.bf16.msra.mxu1 %v2470_v22  ;;  %2238 = vmatpush3.bf16.msra.mxu0 %v2472_v23  ;;  %v2553_v22 = vld [vmem:[%s2964_s26 + $0x38] ss:$24 sps:$4 sm:$0xff]  }
  0x7e   : > { %1233 = vmatprep.mubr.bf16.mxu0 %v2473_v24  ;;  %1297 = vmatprep.mubr.bf16.mxu1 %v2475_v25  ;;  %v2554_v23 = vld [vmem:[%s2964_s26 + $0x40] ss:$24 sps:$4 sm:$0xff]   ;;  %v2555_v24 = vld [vmem:[%s2964_s26 + $0x6c] ss:$24 sps:$4 sm:$0xff]  }
  0x7f   : > { %2127 = vmatprep.subr.bf16.mxu1 %v2479_v26  ;;  %2239 = vmatprep.subr.bf16.mxu0 %v2481_v28  ;;  %v2557_v25 = vld [vmem:[%s2964_s26 + $0x74] ss:$24 sps:$4 sm:$0xff]   ;;  %v2559_v26 = vld [vmem:[%s2964_s26 + $0x68] ss:$24 sps:$4 sm:$0xff]  }
  0x80   : > { %v2561_v28 = vld [vmem:[%s2964_s26 + $0x9c] ss:$24 sps:$4 sm:$0xff]  }
  0x81   : > { %2128 = vmatpush3.bf16.msra.mxu1 %v2480_v27  ;;  %2240 = vmatpush3.bf16.msra.mxu0 %v2482_v29  ;;  %v2560_v27 = vld [vmem:[%s2964_s26 + $0x70] ss:$24 sps:$4 sm:$0xff]   ;;  %v2563_v29 = vld [vmem:[%s2964_s26 + $0xa4] ss:$24 sps:$4 sm:$0xff]  }
  0x82   : > { %2129 = vmatprep.subr.bf16.mxu1 %v2489_v30  ;;  %2241 = vmatprep.subr.bf16.mxu0 %v2491_v33  ;;  %v2565_v30 = vld [vmem:[%s2964_s26 + $0x98] ss:$24 sps:$4 sm:$0xff]   ;;  %v2569_v33 = vld [vmem:[%s2964_s26 + $0xd4] ss:$24 sps:$4 sm:$0xff]  }
  0x84   : > { %1234 = vmatmul.mubr.bf16.gmra.mrb[4].mxu0 %v2477_v31  ;;  %1298 = vmatmul.mubr.bf16.gmra.mrb[4].mxu1 %v2478_v32  ;;  %v2566_v31 = vld [vmem:[%s2964_s26 + $0xa0] ss:$24 sps:$4 sm:$0xff]   ;;  %v2567_v32 = vld [vmem:[%s2964_s26 + $0xcc] ss:$24 sps:$4 sm:$0xff]  }
  0x85   : > { %1241 = vmatprep.mubr.bf16.mxu0 %v2483_v34  ;;  %1305 = vmatprep.mubr.bf16.mxu1 %v2485_v35  ;;  %v2571_v34 = vld [vmem:[%s2964_s26 + $0xc8] ss:$24 sps:$4 sm:$0xff]  }
  0x86   : > { %2130 = vmatpush3.bf16.msra.mxu1 %v2490_v36  ;;  %2242 = vmatpush3.bf16.msra.mxu0 %v2492_v37  ;;  %v2572_v35 = vld [vmem:[%s2964_s26 + $0xd0] ss:$24 sps:$4 sm:$0xff]   ;;  %v2573_v36 = vld [vmem:[%s2964_s26 + $0xfc] ss:$24 sps:$4 sm:$0xff]  }
  0x87   : > { %2131 = vmatprep.subr.bf16.mxu1 %v2499_v38  ;;  %2243 = vmatprep.subr.bf16.mxu0 %v2501_v39  ;;  %v2575_v37 = vld [vmem:[%s2964_s26 + $0x104] ss:$24 sps:$4 sm:$0xff]   ;;  %v2577_v38 = vld [vmem:[%s2964_s26 + $0xf8] ss:$24 sps:$4 sm:$0xff]  }
  0x88   : > { %v2578_v39 = vld [vmem:[%s2964_s26 + $0x100] ss:$24 sps:$4 sm:$0xff]  }
  0x8a   : > { %2132 = vmatpush3.bf16.msra.mxu1 %v2500_v42  ;;  %2244 = vmatpush3.bf16.msra.mxu0 %v2502_v43  ;;  %v2583_v42 = vld [vmem:[%s2964_s26 + $0x128] ss:$24 sps:$4 sm:$0xff]  }
  0x8b   : > { %2133 = vmatprep.subr.bf16.mxu1 %v2509_v46  ;;  %2245 = vmatprep.subr.bf16.mxu0 %v2511_v48  ;;  %v2584_v43 = vld [vmem:[%s2964_s26 + $0x130] ss:$24 sps:$4 sm:$0xff]   ;;  %v2591_v48 = vld [vmem:[%s2964_s26 + $0x18c] ss:$24 sps:$4 sm:$0xff]  }
  0x8c   : > { %1242 = vmatmul.mubr.bf16.gmra.mrb[8].mxu0 %v2487_v40  ;;  %1306 = vmatmul.mubr.bf16.gmra.mrb[8].mxu1 %v2488_v41  ;;  %v2579_v40 = vld [vmem:[%s2964_s26 + $0x12c] ss:$24 sps:$4 sm:$0xff]   ;;  %v2589_v46 = vld [vmem:[%s2964_s26 + $0x158] ss:$24 sps:$4 sm:$0xff]  }
  0x8d   : > { %1249 = vmatprep.mubr.bf16.mxu0 %v2493_v44  ;;  %1313 = vmatprep.mubr.bf16.mxu1 %v2495_v45  ;;  %v2581_v41 = vld [vmem:[%s2964_s26 + $0x134] ss:$24 sps:$4 sm:$0xff]   ;;  %v2587_v45 = vld [vmem:[%s2964_s26 + $0x164] ss:$24 sps:$4 sm:$0xff]  }
  0x8e   : > { %2134 = vmatpush3.bf16.msra.mxu1 %v2510_v47  ;;  %2246 = vmatpush3.bf16.msra.mxu0 %v2512_v49  ;;  %v2585_v44 = vld [vmem:[%s2964_s26 + $0x15c] ss:$24 sps:$4 sm:$0xff]   ;;  %v2590_v47 = vld [vmem:[%s2964_s26 + $0x160] ss:$24 sps:$4 sm:$0xff]  }
  0x8f   : > { %2135 = vmatprep.subr.bf16.mxu1 %v2519_v52  ;;  %2247 = vmatprep.subr.bf16.mxu0 %v2521_v56  ;;  %v2593_v49 = vld [vmem:[%s2964_s26 + $0x194] ss:$24 sps:$4 sm:$0xff]  }
  0x90   : > { %v2597_v52 = vld [vmem:[%s2964_s26 + $0x1bc] ss:$24 sps:$4 sm:$0xff]   ;;  %v2603_v56 = vld [vmem:[%s2964_s26 + $0x1ec] ss:$24 sps:$4 sm:$0xff]  }
  0x92   : > { %2136 = vmatpush3.bf16.msra.mxu1 %v2520_v55  ;;  %2248 = vmatpush3.bf16.msra.mxu0 %v2522_v57  ;;  %v2602_v55 = vld [vmem:[%s2964_s26 + $0x1c0] ss:$24 sps:$4 sm:$0xff]   ;;  %v2605_v57 = vld [vmem:[%s2964_s26 + $0x1f4] ss:$24 sps:$4 sm:$0xff]  }
  0x93   : > { %2137 = vmatprep.subr.bf16.mxu1 %v2529_v58  ;;  %2249 = vmatprep.subr.bf16.mxu0 %v2531_v63  ;;  %v2607_v58 = vld [vmem:[%s2964_s26 + $0x1e8] ss:$24 sps:$4 sm:$0xff]  }
  0x94   : > { %1250 = vmatmul.mubr.bf16.gmra.mrb[12].mxu0 %v2497_v50  ;;  %1314 = vmatmul.mubr.bf16.gmra.mrb[12].mxu1 %v2498_v51  ;;  %v2595_v50 = vld [vmem:[%s2964_s26 + $0x188] ss:$24 sps:$4 sm:$0xff]  }
  0x95   : > { %1257 = vmatprep.mubr.bf16.mxu0 %v2503_v53  ;;  %1321 = vmatprep.mubr.bf16.mxu1 %v2505_v54  ;;  %v2596_v51 = vld [vmem:[%s2964_s26 + $0x190] ss:$24 sps:$4 sm:$0xff]   ;;  %v2599_v53 = vld [vmem:[%s2964_s26 + $0x1c4] ss:$24 sps:$4 sm:$0xff]   ;;  %v2614_v63 = vld [vmem:[%s2964_s26 + $0x220] ss:$24 sps:$4 sm:$0xff]  }
  0x96   : > { %2138 = vmatpush3.bf16.msra.mxu1 %v2530_v61  ;;  %2250 = vmatpush3.bf16.msra.mxu0 %v2532_v0  ;;  %v2601_v54 = vld [vmem:[%s2964_s26 + $0x1b8] ss:$24 sps:$4 sm:$0xff]   ;;  %v2611_v61 = vld [vmem:[%s2964_s26 + $0x224] ss:$24 sps:$4 sm:$0xff]  }
  0x97   : > { %2139 = vmatprep.subr.bf16.mxu1 %v2539_v2  ;;  %2251 = vmatprep.subr.bf16.mxu0 %v2541_v4  ;;  %v2615_v0 = vld [vmem:[%s2964_s26 + $0x24c] ss:$24 sps:$4 sm:$0xff]   ;;  %v2619_v2 = vld [vmem:[%s2964_s26 + $0x248] ss:$24 sps:$4 sm:$0xff]   ;;  %v2621_v4 = vld [vmem:[%s2964_s26 + $0x27c] ss:$24 sps:$4 sm:$0xff]  }
  0x9a   : > { %2140 = vmatpush3.bf16.msra.mxu1 %v2540_v3  ;;  %2252 = vmatpush3.bf16.msra.mxu0 %v2542_v5  ;;  %v2620_v3 = vld [vmem:[%s2964_s26 + $0x250] ss:$24 sps:$4 sm:$0xff]   ;;  %v2623_v5 = vld [vmem:[%s2964_s26 + $0x284] ss:$24 sps:$4 sm:$0xff]  }
  0x9c   : > { %1258 = vmatmul.mubr.bf16.gmra.mrb[16].mxu0 %v2507_v59  ;;  %1322 = vmatmul.mubr.bf16.gmra.mrb[16].mxu1 %v2508_v60  ;;  %v2608_v59 = vld [vmem:[%s2964_s26 + $0x1f0] ss:$24 sps:$4 sm:$0xff]   ;;  %v2609_v60 = vld [vmem:[%s2964_s26 + $0x21c] ss:$24 sps:$4 sm:$0xff]  }
  0x9d   : > { %1265 = vmatprep.mubr.bf16.mxu0 %v2513_v62  ;;  %1329 = vmatprep.mubr.bf16.mxu1 %v2515_v1  ;;  %v2613_v62 = vld [vmem:[%s2964_s26 + $0x218] ss:$24 sps:$4 sm:$0xff]   ;;  %v2617_v1 = vld [vmem:[%s2964_s26 + $0x254] ss:$24 sps:$4 sm:$0xff]  }
  0xa4   : > { %1266 = vmatmul.mubr.bf16.gmra.mrb[20].mxu0 %v2517_v6  ;;  %1330 = vmatmul.mubr.bf16.gmra.mrb[20].mxu1 %v2518_v7  ;;  %v2625_v6 = vld [vmem:[%s2964_s26 + $0x278] ss:$24 sps:$4 sm:$0xff]  }
  0xa5   : > { %1273 = vmatprep.mubr.bf16.mxu0 %v2523_v8  ;;  %1337 = vmatprep.mubr.bf16.mxu1 %v2525_v9  ;;  %v2626_v7 = vld [vmem:[%s2964_s26 + $0x280] ss:$24 sps:$4 sm:$0xff]   ;;  %v2627_v8 = vld [vmem:[%s2964_s26 + $0x2ac] ss:$24 sps:$4 sm:$0xff]  }
  0xa6   : > { %v2629_v9 = vld [vmem:[%s2964_s26 + $0x2b4] ss:$24 sps:$4 sm:$0xff]  }
  0xac   : > { %1274 = vmatmul.mubr.bf16.gmra.mrb[24].mxu0 %v2527_v10  ;;  %1338 = vmatmul.mubr.bf16.gmra.mrb[24].mxu1 %v2528_v11  ;;  %v2631_v10 = vld [vmem:[%s2964_s26 + $0x2a8] ss:$24 sps:$4 sm:$0xff]  }
  0xad   : > { %1281 = vmatprep.mubr.bf16.mxu0 %v2533_v12  ;;  %1345 = vmatprep.mubr.bf16.mxu1 %v2535_v13  ;;  %v2632_v11 = vld [vmem:[%s2964_s26 + $0x2b0] ss:$24 sps:$4 sm:$0xff]   ;;  %v2633_v12 = vld [vmem:[%s2964_s26 + $0x2dc] ss:$24 sps:$4 sm:$0xff]  }
  0xae   : > { %v2635_v13 = vld [vmem:[%s2964_s26 + $0x2e4] ss:$24 sps:$4 sm:$0xff]  }
  0xb4   : > { %1282 = vmatmul.mubr.bf16.gmra.mrb[28].mxu0 %v2537_v14  ;;  %1346 = vmatmul.mubr.bf16.gmra.mrb[28].mxu1 %v2538_v15  ;;  %v2637_v14 = vld [vmem:[%s2964_s26 + $0x2d8] ss:$24 sps:$4 sm:$0xff]  }
  0xb5   : > { %1386 = vmatprep.mubr.bf16.mxu1 %v2545_v16  ;;  %1547 = vmatprep.mubr.bf16.mxu0 %v2548_v17  ;;  %v2638_v15 = vld [vmem:[%s2964_s26 + $0x2e0] ss:$24 sps:$4 sm:$0xff]  }
  0xbc   : > { %1387 = vmatmul.mubr.bf16.vlgmr.msra.gmra.mrb[32].mxu1 %v2543_v18  ;;  %1548 = vmatmul.mubr.bf16.vlgmr.msra.gmra.mrb[32].mxu0 %v2546_v19  ;;  %v3073_v18 = vld [vmem:[%s3296_s2] ss:$0 sm:$0xff] }
  0xbd   : > { %1394 = vmatprep.mubr.bf16.mxu1 %v2549_v20  ;;  %1555 = vmatprep.mubr.bf16.mxu0 %v2551_v21 }
  0xc4   : > { %1395 = vmatmul.mubr.bf16.gmra.mrb[36].mxu1 %v2553_v22  ;;  %1556 = vmatmul.mubr.bf16.gmra.mrb[36].mxu0 %v2554_v23 }
  0xc5   : > { %1402 = vmatprep.mubr.bf16.mxu1 %v2555_v24  ;;  %1563 = vmatprep.mubr.bf16.mxu0 %v2557_v25 }
  0xcc   : > { %1403 = vmatmul.mubr.bf16.gmra.mrb[40].mxu1 %v2559_v26  ;;  %1564 = vmatmul.mubr.bf16.gmra.mrb[40].mxu0 %v2560_v27 }
  0xcd   : > { %1410 = vmatprep.mubr.bf16.mxu1 %v2561_v28  ;;  %1571 = vmatprep.mubr.bf16.mxu0 %v2563_v29 }
  0xd4   : > { %1411 = vmatmul.mubr.bf16.gmra.mrb[44].mxu1 %v2565_v30  ;;  %1572 = vmatmul.mubr.bf16.gmra.mrb[44].mxu0 %v2566_v31 }
  0xd5   : > { %1418 = vmatprep.mubr.bf16.mxu1 %v2567_v32  ;;  %1579 = vmatprep.mubr.bf16.mxu0 %v2569_v33 }
  0xdc   : > { %1419 = vmatmul.mubr.bf16.gmra.mrb[48].mxu1 %v2571_v34  ;;  %1580 = vmatmul.mubr.bf16.gmra.mrb[48].mxu0 %v2572_v35 }
  0xdd   : > { %1426 = vmatprep.mubr.bf16.mxu1 %v2573_v36  ;;  %1587 = vmatprep.mubr.bf16.mxu0 %v2575_v37 }
  0xe4   : > { %1427 = vmatmul.mubr.bf16.gmra.mrb[52].mxu1 %v2577_v38  ;;  %1588 = vmatmul.mubr.bf16.gmra.mrb[52].mxu0 %v2578_v39 }
  0xe5   : > { %1434 = vmatprep.mubr.bf16.mxu1 %v2579_v40  ;;  %1595 = vmatprep.mubr.bf16.mxu0 %v2581_v41 }
  0xec   : > { %1435 = vmatmul.mubr.bf16.gmra.mrb[56].mxu1 %v2583_v42  ;;  %1596 = vmatmul.mubr.bf16.gmra.mrb[56].mxu0 %v2584_v43 }
  0xed   : > { %1442 = vmatprep.mubr.bf16.mxu1 %v2585_v44  ;;  %1603 = vmatprep.mubr.bf16.mxu0 %v2587_v45 }
  0xf4   : > { %1443 = vmatmul.mubr.bf16.gmra.mrb[60].mxu1 %v2589_v46  ;;  %1604 = vmatmul.mubr.bf16.gmra.mrb[60].mxu0 %v2590_v47 }
  0xf5   : > { %1450 = vmatprep.mubr.bf16.mxu1 %v2591_v48  ;;  %1611 = vmatprep.mubr.bf16.mxu0 %v2593_v49 }
  0xfc   : > { %1451 = vmatmul.mubr.bf16.gmra.mrb[64].mxu1 %v2595_v50  ;;  %1612 = vmatmul.mubr.bf16.gmra.mrb[64].mxu0 %v2596_v51 }
  0xfd   : > { %1458 = vmatprep.mubr.bf16.mxu1 %v2597_v52  ;;  %1619 = vmatprep.mubr.bf16.mxu0 %v2599_v53 }
 0x104   : > { %1459 = vmatmul.mubr.bf16.gmra.mrb[68].mxu1 %v2601_v54  ;;  %1620 = vmatmul.mubr.bf16.gmra.mrb[68].mxu0 %v2602_v55 }
 0x105   : > { %1466 = vmatprep.mubr.bf16.mxu1 %v2603_v56  ;;  %1627 = vmatprep.mubr.bf16.mxu0 %v2605_v57 }
 0x10c   : > { %1467 = vmatmul.mubr.bf16.gmra.mrb[72].mxu1 %v2607_v58  ;;  %1628 = vmatmul.mubr.bf16.gmra.mrb[72].mxu0 %v2608_v59 }
 0x10d   : > { %1474 = vmatprep.mubr.bf16.mxu1 %v2609_v60  ;;  %1635 = vmatprep.mubr.bf16.mxu0 %v2611_v61 }
 0x114   : > { %1475 = vmatmul.mubr.bf16.gmra.mrb[76].mxu1 %v2613_v62  ;;  %1636 = vmatmul.mubr.bf16.gmra.mrb[76].mxu0 %v2614_v63 }
 0x115   : > { %1482 = vmatprep.mubr.bf16.mxu1 %v2615_v0  ;;  %1643 = vmatprep.mubr.bf16.mxu0 %v2617_v1 }
 0x11c   : > { %1483 = vmatmul.mubr.bf16.gmra.mrb[80].mxu1 %v2619_v2  ;;  %1644 = vmatmul.mubr.bf16.gmra.mrb[80].mxu0 %v2620_v3 }
 0x11d   : > { %1490 = vmatprep.mubr.bf16.mxu1 %v2621_v4  ;;  %1651 = vmatprep.mubr.bf16.mxu0 %v2623_v5 }
 0x124   : > { %1491 = vmatmul.mubr.bf16.gmra.mrb[84].mxu1 %v2625_v6  ;;  %1652 = vmatmul.mubr.bf16.gmra.mrb[84].mxu0 %v2626_v7 }
 0x125   : > { %1498 = vmatprep.mubr.bf16.mxu1 %v2627_v8  ;;  %1659 = vmatprep.mubr.bf16.mxu0 %v2629_v9 }
 0x12c   : > { %1499 = vmatmul.mubr.bf16.gmra.mrb[88].mxu1 %v2631_v10  ;;  %1660 = vmatmul.mubr.bf16.gmra.mrb[88].mxu0 %v2632_v11 }
 0x12d   : > { %1506 = vmatprep.mubr.bf16.mxu1 %v2633_v12  ;;  %1667 = vmatprep.mubr.bf16.mxu0 %v2635_v13 }
 0x134   : > { %1507 = vmatmul.mubr.bf16.gmra.mrb[92].mxu1 %v2637_v14  ;;  %1668 = vmatmul.mubr.bf16.gmra.mrb[92].mxu0 %v2638_v15 }
 0x14f   : > { %v2029_v16 = vpop.f32.mrb[0].mxu0  ;;  %v2077_v17 = vpop.f32.mrb[0].mxu1 }
 0x150   : > { %v2030_v19 = vpop.f32.mrb[1].mxu0  ;;  %v2078_v20 = vpop.f32.mrb[1].mxu1 }
 0x151   : > { %v3075_v21 = vadd.f32 %v2030_v19, %v2029_v16  ;;  %v2079_v22 = vadd.f32 %v2078_v20, %v2077_v17  ;;  %v2032_v23 = vpop.f32.mrb[2].mxu0  ;;  %v2080_v24 = vpop.f32.mrb[2].mxu1 }
 0x152   : > { %v2033_v25 = vpop.f32.mrb[3].mxu0  ;;  %v2081_v26 = vpop.f32.mrb[3].mxu1 }
 0x153   : > { %v3078_v27 = vadd.f32 %v2079_v22, %v3073_v18  ;;  %v3080_v28 = vadd.f32 %v2033_v25, %v2032_v23  ;;  %v2082_v29 = vadd.f32 %v2081_v26, %v2080_v24 }
 0x155   : > { %v3083_v30 = vadd.f32 %v2082_v29, %v3073_v18 }
 0x157   : > { %v2035_v31 = vpop.f32.mrb[4].mxu0  ;;  %v2083_v32 = vpop.f32.mrb[4].mxu1 }
 0x158   : > { %v2036_v33 = vpop.f32.mrb[5].mxu0  ;;  %v2084_v34 = vpop.f32.mrb[5].mxu1 }
 0x159   : > { %v3085_v35 = vadd.f32 %v2036_v33, %v2035_v31  ;;  %v2085_v36 = vadd.f32 %v2084_v34, %v2083_v32  ;;  %v2038_v37 = vpop.f32.mrb[6].mxu0  ;;  %v2086_v38 = vpop.f32.mrb[6].mxu1 }
 0x15a   : > { %v2039_v39 = vpop.f32.mrb[7].mxu0  ;;  %v2087_v40 = vpop.f32.mrb[7].mxu1 }
 0x15b   : > { %v3088_v41 = vadd.f32 %v2085_v36, %v3073_v18  ;;  %v3090_v42 = vadd.f32 %v2039_v39, %v2038_v37  ;;  %v2088_v43 = vadd.f32 %v2087_v40, %v2086_v38 }
 0x15d   : > { %v3093_v44 = vadd.f32 %v2088_v43, %v3073_v18 }
 0x15f   : > { %v2041_v45 = vpop.f32.mrb[8].mxu0  ;;  %v2089_v46 = vpop.f32.mrb[8].mxu1 }
 0x160   : > { %v2042_v47 = vpop.f32.mrb[9].mxu0  ;;  %v2090_v48 = vpop.f32.mrb[9].mxu1 }
 0x161   : > { %v3095_v49 = vadd.f32 %v2042_v47, %v2041_v45  ;;  %v2091_v50 = vadd.f32 %v2090_v48, %v2089_v46  ;;  %v2044_v51 = vpop.f32.mrb[10].mxu0  ;;  %v2092_v52 = vpop.f32.mrb[10].mxu1 }
 0x162   : > { %v2045_v53 = vpop.f32.mrb[11].mxu0  ;;  %v2093_v54 = vpop.f32.mrb[11].mxu1 }
 0x163   : > { %v3098_v55 = vadd.f32 %v2091_v50, %v3073_v18  ;;  %v3100_v56 = vadd.f32 %v2045_v53, %v2044_v51  ;;  %v2094_v57 = vadd.f32 %v2093_v54, %v2092_v52 }
 0x165   : > { %v3103_v58 = vadd.f32 %v2094_v57, %v3073_v18 }
 0x167   : > { %v2047_v59 = vpop.f32.mrb[12].mxu0  ;;  %v2095_v60 = vpop.f32.mrb[12].mxu1 }
 0x168   : > { %v2048_v61 = vpop.f32.mrb[13].mxu0  ;;  %v2096_v62 = vpop.f32.mrb[13].mxu1 }
 0x169   : > { %v3105_v63 = vadd.f32 %v2048_v61, %v2047_v59  ;;  %v2097_v0 = vadd.f32 %v2096_v62, %v2095_v60  ;;  %v2050_v1 = vpop.f32.mrb[14].mxu0  ;;  %v2098_v2 = vpop.f32.mrb[14].mxu1 }
 0x16a   : > { %v2051_v3 = vpop.f32.mrb[15].mxu0  ;;  %v2099_v4 = vpop.f32.mrb[15].mxu1 }
 0x16b   : > { %v3108_v5 = vadd.f32 %v2097_v0, %v3073_v18  ;;  %v3110_v6 = vadd.f32 %v2051_v3, %v2050_v1  ;;  %v2100_v7 = vadd.f32 %v2099_v4, %v2098_v2 }
 0x16d   : > { %v3113_v8 = vadd.f32 %v2100_v7, %v3073_v18 }
 0x16f   : > { %v2053_v9 = vpop.f32.mrb[16].mxu0  ;;  %v2101_v10 = vpop.f32.mrb[16].mxu1 }
 0x170   : > { %v2054_v11 = vpop.f32.mrb[17].mxu0  ;;  %v2102_v12 = vpop.f32.mrb[17].mxu1 }
 0x171   : > { %v3115_v13 = vadd.f32 %v2054_v11, %v2053_v9  ;;  %v2103_v14 = vadd.f32 %v2102_v12, %v2101_v10  ;;  %v2056_v15 = vpop.f32.mrb[18].mxu0  ;;  %v2104_v16 = vpop.f32.mrb[18].mxu1 }
 0x172   : > { %v2057_v17 = vpop.f32.mrb[19].mxu0  ;;  %v2105_v19 = vpop.f32.mrb[19].mxu1 }
 0x173   : > { %v3118_v20 = vadd.f32 %v2103_v14, %v3073_v18  ;;  %v3120_v22 = vadd.f32 %v2057_v17, %v2056_v15  ;;  %v2106_v23 = vadd.f32 %v2105_v19, %v2104_v16 }
 0x175   : > { %v3123_v24 = vadd.f32 %v2106_v23, %v3073_v18 }
 0x177   : > { %v2059_v25 = vpop.f32.mrb[20].mxu0  ;;  %v2107_v26 = vpop.f32.mrb[20].mxu1 }
 0x178   : > { %v2060_v29 = vpop.f32.mrb[21].mxu0  ;;  %v2108_v31 = vpop.f32.mrb[21].mxu1 }
 0x179   : > { %v3125_v32 = vadd.f32 %v2060_v29, %v2059_v25  ;;  %v2109_v33 = vadd.f32 %v2108_v31, %v2107_v26  ;;  %v2062_v34 = vpop.f32.mrb[22].mxu0  ;;  %v2110_v36 = vpop.f32.mrb[22].mxu1  ;;  %v1228_v31 = vadd.f32 %v3075_v21, %v3073_v18 }
 0x17a   : > { %v2063_v37 = vpop.f32.mrb[23].mxu0  ;;  %v2111_v38 = vpop.f32.mrb[23].mxu1 }
 0x17b   : > { %v3128_v39 = vadd.f32 %v2109_v33, %v3073_v18  ;;  %v3130_v40 = vadd.f32 %v2063_v37, %v2062_v34  ;;  %v2112_v43 = vadd.f32 %v2111_v38, %v2110_v36 }
 0x17d   : > { %v3133_v45 = vadd.f32 %v2112_v43, %v3073_v18 }
 0x17f   : > { %v2065_v46 = vpop.f32.mrb[24].mxu0  ;;  %v2113_v47 = vpop.f32.mrb[24].mxu1 }
 0x180   : > { %v2066_v48 = vpop.f32.mrb[25].mxu0  ;;  %v2114_v50 = vpop.f32.mrb[25].mxu1 }
 0x181   : > { %v3135_v51 = vadd.f32 %v2066_v48, %v2065_v46  ;;  %v2115_v52 = vadd.f32 %v2114_v50, %v2113_v47  ;;  %v2068_v53 = vpop.f32.mrb[26].mxu0  ;;  %v2116_v54 = vpop.f32.mrb[26].mxu1  ;;  %v1231_v46 = vadd.f32 %v3080_v28, %v3073_v18 }
 0x182   : > { %v2069_v57 = vpop.f32.mrb[27].mxu0  ;;  %v2117_v59 = vpop.f32.mrb[27].mxu1 }
 0x183   : > { %v3138_v60 = vadd.f32 %v2115_v52, %v3073_v18  ;;  %v3140_v61 = vadd.f32 %v2069_v57, %v2068_v53  ;;  %v2118_v62 = vadd.f32 %v2117_v59, %v2116_v54 }
 0x185   : > { %v3143_v0 = vadd.f32 %v2118_v62, %v3073_v18 }
 0x187   : > { %v2071_v1 = vpop.f32.mrb[28].mxu0  ;;  %v2119_v2 = vpop.f32.mrb[28].mxu1 }
 0x188   : > { %v2072_v3 = vpop.f32.mrb[29].mxu0  ;;  %v2120_v4 = vpop.f32.mrb[29].mxu1 }
 0x189   : > { %v3145_v7 = vadd.f32 %v2072_v3, %v2071_v1  ;;  %v2121_v9 = vadd.f32 %v2120_v4, %v2119_v2  ;;  %v2074_v10 = vpop.f32.mrb[30].mxu0  ;;  %v2122_v11 = vpop.f32.mrb[30].mxu1  ;;  %v1236_v2 = vadd.f32 %v3085_v35, %v3073_v18 }
 0x18a   : > { %v2075_v12 = vpop.f32.mrb[31].mxu0  ;;  %v2123_v14 = vpop.f32.mrb[31].mxu1 }
 0x18b   : > { %v3148_v15 = vadd.f32 %v2121_v9, %v3073_v18  ;;  %v3150_v16 = vadd.f32 %v2075_v12, %v2074_v10  ;;  %v2124_v17 = vadd.f32 %v2123_v14, %v2122_v11  ;;  %v1239_v14 = vadd.f32 %v3090_v42, %v3073_v18 }
 0x18d   : > { %v3153_v19 = vadd.f32 %v2124_v17, %v3073_v18 }
 0x18f   : > { %v2141_v23 = vpop.f32.mrb[32].mxu1  ;;  %v2253_v25 = vpop.f32.mrb[32].mxu0 }
 0x190   : > { %v2142_v26 = vpop.f32.mrb[33].mxu1  ;;  %v2254_v29 = vpop.f32.mrb[33].mxu0 }
 0x191   : > { %v2143_v33 = vadd.f32 %v2142_v26, %v2141_v23  ;;  %v2255_v34 = vadd.f32 %v2254_v29, %v2253_v25  ;;  %v2144_v36 = vpop.f32.mrb[34].mxu1  ;;  %v2256_v37 = vpop.f32.mrb[34].mxu0 }
 0x192   : > { %v2145_v38 = vpop.f32.mrb[35].mxu1  ;;  %v2257_v43 = vpop.f32.mrb[35].mxu0 }
 0x193   : > { %v1389_v47 = vadd.f32 %v2143_v33, %v1228_v31  ;;  %v2146_v48 = vadd.f32 %v2145_v38, %v2144_v36  ;;  %v2258_v50 = vadd.f32 %v2257_v43, %v2256_v37  ;;  %v1244_v38 = vadd.f32 %v3095_v49, %v3073_v18 }
 0x195   : > { %v1550_v52 = vadd.f32 %v2255_v34, %v1389_v47  ;;  %v1392_v53 = vadd.f32 %v2146_v48, %v1231_v46 }
 0x197   : > { %v1676_v54 = vmax.f32 %v1550_v52, 0.0  ;;  %v1553_v57 = vadd.f32 %v2258_v50, %v1392_v53  ;;  %v2147_v59 = vpop.f32.mrb[36].mxu1  ;;  %v2259_v62 = vpop.f32.mrb[36].mxu0  ;;  %v1247_v53 = vadd.f32 %v3100_v56, %v3073_v18 }
 0x198   : > { %v2148_v21 = vpop.f32.mrb[37].mxu1  ;;  %v2260_v1 = vpop.f32.mrb[37].mxu0 }
 0x199   : > { %1708 = vst [vmem:[%s3162_s7] sm:$0xff] %v1676_v54  ;;  %v1677_v28 = vmax.f32 %v1553_v57, 0.0  ;;  %v2149_v3 = vadd.f32 %v2148_v21, %v2147_v59  ;;  %v2261_v4 = vadd.f32 %v2260_v1, %v2259_v62  ;;  %v2150_v9 = vpop.f32.mrb[38].mxu1  ;;  %v2262_v10 = vpop.f32.mrb[38].mxu0 }
 0x19a   : > { %v2151_v11 = vpop.f32.mrb[39].mxu1  ;;  %v2263_v12 = vpop.f32.mrb[39].mxu0 }
 0x19b   : > { %1709 = vst [vmem:[%s3162_s7 + $0x8] sm:$0xff] %v1677_v28  ;;  %v1397_v17 = vadd.f32 %v2149_v3, %v1236_v2  ;;  %v2152_v23 = vadd.f32 %v2151_v11, %v2150_v9  ;;  %v2264_v35 = vadd.f32 %v2263_v12, %v2262_v10  ;;  %v1252_v9 = vadd.f32 %v3105_v63, %v3073_v18 }
 0x19d   : > { %v1558_v25 = vadd.f32 %v2261_v4, %v1397_v17  ;;  %v1400_v26 = vadd.f32 %v2152_v23, %v1239_v14 }
 0x19f   : > { %v1678_v29 = vmax.f32 %v1558_v25, 0.0  ;;  %v1561_v31 = vadd.f32 %v2264_v35, %v1400_v26  ;;  %v2153_v33 = vpop.f32.mrb[40].mxu1  ;;  %v2265_v34 = vpop.f32.mrb[40].mxu0  ;;  %v1255_v35 = vadd.f32 %v3110_v6, %v3073_v18 }
 0x1a0   : > { %v2154_v36 = vpop.f32.mrb[41].mxu1  ;;  %v2266_v37 = vpop.f32.mrb[41].mxu0 }
 0x1a1   : > { %1710 = vst [vmem:[%s3162_s7 + $0x10] sm:$0xff] %v1678_v29  ;;  %v1679_v43 = vmax.f32 %v1561_v31, 0.0  ;;  %v2155_v46 = vadd.f32 %v2154_v36, %v2153_v33  ;;  %v2267_v42 = vadd.f32 %v2266_v37, %v2265_v34  ;;  %v2156_v47 = vpop.f32.mrb[42].mxu1  ;;  %v2268_v48 = vpop.f32.mrb[42].mxu0 }
 0x1a2   : > { %v2157_v50 = vpop.f32.mrb[43].mxu1  ;;  %v2269_v52 = vpop.f32.mrb[43].mxu0 }
 0x1a3   : > { %1711 = vst [vmem:[%s3162_s7 + $0x18] sm:$0xff] %v1679_v43  ;;  %v1405_v54 = vadd.f32 %v2155_v46, %v1244_v38  ;;  %v2158_v57 = vadd.f32 %v2157_v50, %v2156_v47  ;;  %v2270_v59 = vadd.f32 %v2269_v52, %v2268_v48  ;;  %v1260_v46 = vadd.f32 %v3115_v13, %v3073_v18 }
 0x1a5   : > { %v1566_v62 = vadd.f32 %v2267_v42, %v1405_v54  ;;  %v1408_v21 = vadd.f32 %v2158_v57, %v1247_v53  ;;  %v1263_v54 = vadd.f32 %v3120_v22, %v3073_v18 }
 0x1a7   : > { %v1680_v1 = vmax.f32 %v1566_v62, 0.0  ;;  %v1569_v49 = vadd.f32 %v2270_v59, %v1408_v21  ;;  %v2159_v2 = vpop.f32.mrb[44].mxu1  ;;  %v2271_v28 = vpop.f32.mrb[44].mxu0 }
 0x1a8   : > { %v2160_v3 = vpop.f32.mrb[45].mxu1  ;;  %v2272_v4 = vpop.f32.mrb[45].mxu0 }
 0x1a9   : > { %1712 = vst [vmem:[%s3162_s7 + $0x20] sm:$0xff] %v1680_v1  ;;  %v1681_v10 = vmax.f32 %v1569_v49, 0.0  ;;  %v2161_v11 = vadd.f32 %v2160_v3, %v2159_v2  ;;  %v2273_v56 = vadd.f32 %v2272_v4, %v2271_v28  ;;  %v2162_v12 = vpop.f32.mrb[46].mxu1  ;;  %v2274_v14 = vpop.f32.mrb[46].mxu0 }
 0x1aa   : > { %v2163_v17 = vpop.f32.mrb[47].mxu1  ;;  %v2275_v23 = vpop.f32.mrb[47].mxu0 }
 0x1ab   : > { %1713 = vst [vmem:[%s3162_s7 + $0x28] sm:$0xff] %v1681_v10  ;;  %v1413_v25 = vadd.f32 %v2161_v11, %v1252_v9  ;;  %v2164_v26 = vadd.f32 %v2163_v17, %v2162_v12  ;;  %v2276_v29 = vadd.f32 %v2275_v23, %v2274_v14  ;;  %v1268_v9 = vadd.f32 %v3125_v32, %v3073_v18 }
 0x1ac   : > { %v1271_v23 = vadd.f32 %v3130_v40, %v3073_v18 }
 0x1ad   : > { %v1574_v31 = vadd.f32 %v2273_v56, %v1413_v25  ;;  %v1416_v33 = vadd.f32 %v2164_v26, %v1255_v35 }
 0x1af   : > { %v1682_v34 = vmax.f32 %v1574_v31, 0.0  ;;  %v1577_v63 = vadd.f32 %v2276_v29, %v1416_v33  ;;  %v2165_v36 = vpop.f32.mrb[48].mxu1  ;;  %v2277_v37 = vpop.f32.mrb[48].mxu0 }
 0x1b0   : > { %v2166_v38 = vpop.f32.mrb[49].mxu1  ;;  %v2278_v43 = vpop.f32.mrb[49].mxu0 }
 0x1b1   : > { %1714 = vst [vmem:[%s3162_s7 + $0x30] sm:$0xff] %v1682_v34  ;;  %v1683_v42 = vmax.f32 %v1577_v63, 0.0  ;;  %v2167_v47 = vadd.f32 %v2166_v38, %v2165_v36  ;;  %v2279_v6 = vadd.f32 %v2278_v43, %v2277_v37  ;;  %v2168_v48 = vpop.f32.mrb[50].mxu1  ;;  %v2280_v50 = vpop.f32.mrb[50].mxu0  ;;  %v1276_v38 = vadd.f32 %v3135_v51, %v3073_v18 }
 0x1b2   : > { %v2169_v52 = vpop.f32.mrb[51].mxu1  ;;  %v2281_v53 = vpop.f32.mrb[51].mxu0 }
 0x1b3   : > { %1715 = vst [vmem:[%s3162_s7 + $0x38] sm:$0xff] %v1683_v42  ;;  %v1421_v57 = vadd.f32 %v2167_v47, %v1260_v46  ;;  %v2170_v59 = vadd.f32 %v2169_v52, %v2168_v48  ;;  %v2282_v62 = vadd.f32 %v2281_v53, %v2280_v50  ;;  %v1279_v50 = vadd.f32 %v3140_v61, %v3073_v18 }
 0x1b5   : > { %v1582_v21 = vadd.f32 %v2279_v6, %v1421_v57  ;;  %v1424_v1 = vadd.f32 %v2170_v59, %v1263_v54 }
 0x1b7   : > { %v1684_v49 = vmax.f32 %v1582_v21, 0.0  ;;  %v1585_v13 = vadd.f32 %v2282_v62, %v1424_v1  ;;  %v2171_v2 = vpop.f32.mrb[52].mxu1  ;;  %v2283_v28 = vpop.f32.mrb[52].mxu0 }
 0x1b8   : > { %v2172_v3 = vpop.f32.mrb[53].mxu1  ;;  %v2284_v4 = vpop.f32.mrb[53].mxu0 }
 0x1b9   : > { %1716 = vst [vmem:[%s3162_s7 + $0x40] sm:$0xff] %v1684_v49  ;;  %v1685_v10 = vmax.f32 %v1585_v13, 0.0  ;;  %v2173_v11 = vadd.f32 %v2172_v3, %v2171_v2  ;;  %v2285_v22 = vadd.f32 %v2284_v4, %v2283_v28  ;;  %v2174_v56 = vpop.f32.mrb[54].mxu1  ;;  %v2286_v12 = vpop.f32.mrb[54].mxu0  ;;  %v1284_v2 = vadd.f32 %v3145_v7, %v3073_v18 }
 0x1ba   : > { %v2175_v14 = vpop.f32.mrb[55].mxu1  ;;  %v2287_v17 = vpop.f32.mrb[55].mxu0 }
 0x1bb   : > { %1717 = vst [vmem:[%s3162_s7 + $0x48] sm:$0xff] %v1685_v10  ;;  %v1429_v35 = vadd.f32 %v2173_v11, %v1268_v9  ;;  %v2176_v25 = vadd.f32 %v2175_v14, %v2174_v56  ;;  %v2288_v26 = vadd.f32 %v2287_v17, %v2286_v12 }
 0x1bd   : > { %v1590_v29 = vadd.f32 %v2285_v22, %v1429_v35  ;;  %v1432_v31 = vadd.f32 %v2176_v25, %v1271_v23  ;;  %v1287_v22 = vadd.f32 %v3150_v16, %v3073_v18 }
 0x1bf   : > { %v1686_v33 = vmax.f32 %v1590_v29, 0.0  ;;  %v1593_v32 = vadd.f32 %v2288_v26, %v1432_v31  ;;  %v2177_v34 = vpop.f32.mrb[56].mxu1  ;;  %v2289_v63 = vpop.f32.mrb[56].mxu0 }
 0x1c0   : > { %v2178_v36 = vpop.f32.mrb[57].mxu1  ;;  %v2290_v37 = vpop.f32.mrb[57].mxu0 }
 0x1c1   : > { %1718 = vst [vmem:[%s3162_s7 + $0x50] sm:$0xff] %v1686_v33  ;;  %v1687_v43 = vmax.f32 %v1593_v32, 0.0  ;;  %v2179_v46 = vadd.f32 %v2178_v36, %v2177_v34  ;;  %v2291_v40 = vadd.f32 %v2290_v37, %v2289_v63  ;;  %v2180_v42 = vpop.f32.mrb[58].mxu1  ;;  %v2292_v47 = vpop.f32.mrb[58].mxu0 }
 0x1c2   : > { %v2181_v6 = vpop.f32.mrb[59].mxu1  ;;  %v2293_v48 = vpop.f32.mrb[59].mxu0 }
 0x1c3   : > { %1719 = vst [vmem:[%s3162_s7 + $0x58] sm:$0xff] %v1687_v43  ;;  %v1437_v52 = vadd.f32 %v2179_v46, %v1276_v38  ;;  %v2182_v53 = vadd.f32 %v2181_v6, %v2180_v42  ;;  %v2294_v54 = vadd.f32 %v2293_v48, %v2292_v47 }
 0x1c5   : > { %v1598_v57 = vadd.f32 %v2291_v40, %v1437_v52  ;;  %v1440_v59 = vadd.f32 %v2182_v53, %v1279_v50 }
 0x1c7   : > { %v1688_v62 = vmax.f32 %v1598_v57, 0.0  ;;  %v1601_v51 = vadd.f32 %v2294_v54, %v1440_v59  ;;  %v2183_v21 = vpop.f32.mrb[60].mxu1  ;;  %v2295_v1 = vpop.f32.mrb[60].mxu0 }
 0x1c8   : > { %v2184_v49 = vpop.f32.mrb[61].mxu1  ;;  %v2296_v13 = vpop.f32.mrb[61].mxu0 }
 0x1c9   : > { %1720 = vst [vmem:[%s3162_s7 + $0x60] sm:$0xff] %v1688_v62  ;;  %v1689_v28 = vmax.f32 %v1601_v51, 0.0  ;;  %v2185_v3 = vadd.f32 %v2184_v49, %v2183_v21  ;;  %v2297_v61 = vadd.f32 %v2296_v13, %v2295_v1  ;;  %v2186_v4 = vpop.f32.mrb[62].mxu1  ;;  %v2298_v9 = vpop.f32.mrb[62].mxu0 }
 0x1ca   : > { %v2187_v10 = vpop.f32.mrb[63].mxu1  ;;  %v2299_v11 = vpop.f32.mrb[63].mxu0 }
 0x1cb   : > { %1721 = vst [vmem:[%s3162_s7 + $0x68] sm:$0xff] %v1689_v28  ;;  %v1445_v56 = vadd.f32 %v2185_v3, %v1284_v2  ;;  %v2188_v12 = vadd.f32 %v2187_v10, %v2186_v4  ;;  %v2300_v14 = vadd.f32 %v2299_v11, %v2298_v9 }
 0x1cd   : > { %v1606_v17 = vadd.f32 %v2297_v61, %v1445_v56  ;;  %v1448_v23 = vadd.f32 %v2188_v12, %v1287_v22 }
 0x1cf   : > { %v1690_v7 = vmax.f32 %v1606_v17, 0.0  ;;  %v1609_v35 = vadd.f32 %v2300_v14, %v1448_v23  ;;  %v2189_v25 = vpop.f32.mrb[64].mxu1  ;;  %v2301_v26 = vpop.f32.mrb[64].mxu0 }
 0x1d0   : > { %v2190_v29 = vpop.f32.mrb[65].mxu1  ;;  %v2302_v31 = vpop.f32.mrb[65].mxu0 }
 0x1d1   : > { %1722 = vst [vmem:[%s3162_s7 + $0x70] sm:$0xff] %v1690_v7  ;;  %v1691_v33 = vmax.f32 %v1609_v35, 0.0  ;;  %v2191_v32 = vadd.f32 %v2190_v29, %v2189_v25  ;;  %v2303_v34 = vadd.f32 %v2302_v31, %v2301_v26  ;;  %v2192_v63 = vpop.f32.mrb[66].mxu1  ;;  %v2304_v18 = vpop.f32.mrb[66].mxu0 }
 0x1d2   : > { %v2193_v16 = vpop.f32.mrb[67].mxu1  ;;  %v2305_v36 = vpop.f32.mrb[67].mxu0 }
 0x1d3   : > { %1723 = vst [vmem:[%s3162_s7 + $0x78] sm:$0xff] %v1691_v33  ;;  %v1453_v37 = vadd.f32 %v2191_v32, %v3078_v27  ;;  %v2194_v38 = vadd.f32 %v2193_v16, %v2192_v63  ;;  %v2306_v43 = vadd.f32 %v2305_v36, %v2304_v18 }
 0x1d5   : > { %v1614_v46 = vadd.f32 %v2303_v34, %v1453_v37  ;;  %v1456_v40 = vadd.f32 %v2194_v38, %v3083_v30 }
 0x1d7   : > { %v1692_v42 = vmax.f32 %v1614_v46, 0.0  ;;  %v1617_v47 = vadd.f32 %v2306_v43, %v1456_v40  ;;  %v2195_v6 = vpop.f32.mrb[68].mxu1  ;;  %v2307_v48 = vpop.f32.mrb[68].mxu0 }
 0x1d8   : > { %v2196_v50 = vpop.f32.mrb[69].mxu1  ;;  %v2308_v52 = vpop.f32.mrb[69].mxu0 }
 0x1d9   : > { %1724 = vst [vmem:[%s3162_s7 + $0x80] sm:$0xff] %v1692_v42  ;;  %v1693_v53 = vmax.f32 %v1617_v47, 0.0  ;;  %v2197_v54 = vadd.f32 %v2196_v50, %v2195_v6  ;;  %v2309_v57 = vadd.f32 %v2308_v52, %v2307_v48  ;;  %v2198_v59 = vpop.f32.mrb[70].mxu1  ;;  %v2310_v62 = vpop.f32.mrb[70].mxu0 }
 0x1da   : > { %v2199_v27 = vpop.f32.mrb[71].mxu1  ;;  %v2311_v51 = vpop.f32.mrb[71].mxu0 }
 0x1db   : > { %1725 = vst [vmem:[%s3162_s7 + $0x88] sm:$0xff] %v1693_v53  ;;  %v1461_v21 = vadd.f32 %v2197_v54, %v3088_v41  ;;  %v2200_v1 = vadd.f32 %v2199_v27, %v2198_v59  ;;  %v2312_v30 = vadd.f32 %v2311_v51, %v2310_v62 }
 0x1dd   : > { %v1622_v49 = vadd.f32 %v2309_v57, %v1461_v21  ;;  %v1464_v13 = vadd.f32 %v2200_v1, %v3093_v44 }
 0x1df   : > { %v1694_v2 = vmax.f32 %v1622_v49, 0.0  ;;  %v1625_v28 = vadd.f32 %v2312_v30, %v1464_v13  ;;  %v2201_v3 = vpop.f32.mrb[72].mxu1  ;;  %v2313_v61 = vpop.f32.mrb[72].mxu0 }
 0x1e0   : > { %v2202_v4 = vpop.f32.mrb[73].mxu1  ;;  %v2314_v9 = vpop.f32.mrb[73].mxu0 }
 0x1e1   : > { %1726 = vst [vmem:[%s3162_s7 + $0x90] sm:$0xff] %v1694_v2  ;;  %v1695_v10 = vmax.f32 %v1625_v28, 0.0  ;;  %v2203_v11 = vadd.f32 %v2202_v4, %v2201_v3  ;;  %v2315_v22 = vadd.f32 %v2314_v9, %v2313_v61  ;;  %v2204_v56 = vpop.f32.mrb[74].mxu1  ;;  %v2316_v12 = vpop.f32.mrb[74].mxu0 }
 0x1e2   : > { %v2205_v41 = vpop.f32.mrb[75].mxu1  ;;  %v2317_v14 = vpop.f32.mrb[75].mxu0 }
 0x1e3   : > { %1727 = vst [vmem:[%s3162_s7 + $0x98] sm:$0xff] %v1695_v10  ;;  %v1469_v17 = vadd.f32 %v2203_v11, %v3098_v55  ;;  %v2206_v23 = vadd.f32 %v2205_v41, %v2204_v56  ;;  %v2318_v44 = vadd.f32 %v2317_v14, %v2316_v12 }
 0x1e5   : > { %v1630_v7 = vadd.f32 %v2315_v22, %v1469_v17  ;;  %v1472_v35 = vadd.f32 %v2206_v23, %v3103_v58 }
 0x1e7   : > { %v1696_v25 = vmax.f32 %v1630_v7, 0.0  ;;  %v1633_v26 = vadd.f32 %v2318_v44, %v1472_v35  ;;  %v2207_v29 = vpop.f32.mrb[76].mxu1  ;;  %v2319_v31 = vpop.f32.mrb[76].mxu0 }
 0x1e8   : > { %v2208_v33 = vpop.f32.mrb[77].mxu1  ;;  %v2320_v32 = vpop.f32.mrb[77].mxu0 }
 0x1e9   : > { %1728 = vst [vmem:[%s3162_s7 + $0xa0] sm:$0xff] %v1696_v25  ;;  %v1697_v34 = vmax.f32 %v1633_v26, 0.0  ;;  %v2209_v63 = vadd.f32 %v2208_v33, %v2207_v29  ;;  %v2321_v18 = vadd.f32 %v2320_v32, %v2319_v31  ;;  %v2210_v16 = vpop.f32.mrb[78].mxu1  ;;  %v2322_v36 = vpop.f32.mrb[78].mxu0 }
 0x1ea   : > { %v2211_v55 = vpop.f32.mrb[79].mxu1  ;;  %v2323_v37 = vpop.f32.mrb[79].mxu0 }
 0x1eb   : > { %1729 = vst [vmem:[%s3162_s7 + $0xa8] sm:$0xff] %v1697_v34  ;;  %v1477_v38 = vadd.f32 %v2209_v63, %v3108_v5  ;;  %v2212_v43 = vadd.f32 %v2211_v55, %v2210_v16  ;;  %v2324_v58 = vadd.f32 %v2323_v37, %v2322_v36 }
 0x1ed   : > { %v1638_v46 = vadd.f32 %v2321_v18, %v1477_v38  ;;  %v1480_v40 = vadd.f32 %v2212_v43, %v3113_v8 }
 0x1ef   : > { %v1698_v42 = vmax.f32 %v1638_v46, 0.0  ;;  %v1641_v47 = vadd.f32 %v2324_v58, %v1480_v40  ;;  %v2213_v6 = vpop.f32.mrb[80].mxu1  ;;  %v2325_v48 = vpop.f32.mrb[80].mxu0 }
 0x1f0   : > { %v2214_v50 = vpop.f32.mrb[81].mxu1  ;;  %v2326_v52 = vpop.f32.mrb[81].mxu0 }
 0x1f1   : > { %1730 = vst [vmem:[%s3162_s7 + $0xb0] sm:$0xff] %v1698_v42  ;;  %v1699_v53 = vmax.f32 %v1641_v47, 0.0  ;;  %v2215_v54 = vadd.f32 %v2214_v50, %v2213_v6  ;;  %v2327_v57 = vadd.f32 %v2326_v52, %v2325_v48  ;;  %v2216_v59 = vpop.f32.mrb[82].mxu1  ;;  %v2328_v62 = vpop.f32.mrb[82].mxu0 }
 0x1f2   : > { %v2217_v5 = vpop.f32.mrb[83].mxu1  ;;  %v2329_v27 = vpop.f32.mrb[83].mxu0 }
 0x1f3   : > { %1731 = vst [vmem:[%s3162_s7 + $0xb8] sm:$0xff] %v1699_v53  ;;  %v1485_v51 = vadd.f32 %v2215_v54, %v3118_v20  ;;  %v2218_v21 = vadd.f32 %v2217_v5, %v2216_v59  ;;  %v2330_v8 = vadd.f32 %v2329_v27, %v2328_v62 }
 0x1f5   : > { %v1646_v1 = vadd.f32 %v2327_v57, %v1485_v51  ;;  %v1488_v30 = vadd.f32 %v2218_v21, %v3123_v24 }
 0x1f7   : > { %v1700_v49 = vmax.f32 %v1646_v1, 0.0  ;;  %v1649_v13 = vadd.f32 %v2330_v8, %v1488_v30  ;;  %v2219_v2 = vpop.f32.mrb[84].mxu1  ;;  %v2331_v28 = vpop.f32.mrb[84].mxu0 }
 0x1f8   : > { %v2220_v3 = vpop.f32.mrb[85].mxu1  ;;  %v2332_v61 = vpop.f32.mrb[85].mxu0 }
 0x1f9   : > { %1732 = vst [vmem:[%s3162_s7 + $0xc0] sm:$0xff] %v1700_v49  ;;  %v1701_v4 = vmax.f32 %v1649_v13, 0.0  ;;  %v2221_v9 = vadd.f32 %v2220_v3, %v2219_v2  ;;  %v2333_v10 = vadd.f32 %v2332_v61, %v2331_v28  ;;  %v2222_v11 = vpop.f32.mrb[86].mxu1  ;;  %v2334_v22 = vpop.f32.mrb[86].mxu0 }
 0x1fa   : > { %v2223_v20 = vpop.f32.mrb[87].mxu1  ;;  %v2335_v56 = vpop.f32.mrb[87].mxu0 }
 0x1fb   : > { %1733 = vst [vmem:[%s3162_s7 + $0xc8] sm:$0xff] %v1701_v4  ;;  %v1493_v12 = vadd.f32 %v2221_v9, %v3128_v39  ;;  %v2224_v41 = vadd.f32 %v2223_v20, %v2222_v11  ;;  %v2336_v24 = vadd.f32 %v2335_v56, %v2334_v22 }
 0x1fd   : > { %v1654_v14 = vadd.f32 %v2333_v10, %v1493_v12  ;;  %v1496_v17 = vadd.f32 %v2224_v41, %v3133_v45 }
 0x1ff   : > { %v1702_v23 = vmax.f32 %v1654_v14, 0.0  ;;  %v1657_v44 = vadd.f32 %v2336_v24, %v1496_v17  ;;  %v2225_v7 = vpop.f32.mrb[88].mxu1  ;;  %v2337_v35 = vpop.f32.mrb[88].mxu0 }
 0x200   : > { %v2226_v25 = vpop.f32.mrb[89].mxu1  ;;  %v2338_v26 = vpop.f32.mrb[89].mxu0 }
 0x201   : > { %1734 = vst [vmem:[%s3162_s7 + $0xd0] sm:$0xff] %v1702_v23  ;;  %v1703_v29 = vmax.f32 %v1657_v44, 0.0  ;;  %v2227_v31 = vadd.f32 %v2226_v25, %v2225_v7  ;;  %v2339_v33 = vadd.f32 %v2338_v26, %v2337_v35  ;;  %v2228_v32 = vpop.f32.mrb[90].mxu1  ;;  %v2340_v34 = vpop.f32.mrb[90].mxu0 }
 0x202   : > { %v2229_v39 = vpop.f32.mrb[91].mxu1  ;;  %v2341_v63 = vpop.f32.mrb[91].mxu0 }
 0x203   : > { %1735 = vst [vmem:[%s3162_s7 + $0xd8] sm:$0xff] %v1703_v29  ;;  %v1501_v18 = vadd.f32 %v2227_v31, %v3138_v60  ;;  %v2230_v16 = vadd.f32 %v2229_v39, %v2228_v32  ;;  %v2342_v45 = vadd.f32 %v2341_v63, %v2340_v34 }
 0x205   : > { %v1662_v36 = vadd.f32 %v2339_v33, %v1501_v18  ;;  %v1504_v55 = vadd.f32 %v2230_v16, %v3143_v0 }
 0x207   : > { %v1704_v37 = vmax.f32 %v1662_v36, 0.0  ;;  %v1665_v38 = vadd.f32 %v2342_v45, %v1504_v55  ;;  %v2231_v43 = vpop.f32.mrb[92].mxu1  ;;  %v2343_v58 = vpop.f32.mrb[92].mxu0 }
 0x208   : > { %v2232_v46 = vpop.f32.mrb[93].mxu1  ;;  %v2344_v40 = vpop.f32.mrb[93].mxu0 }
 0x209   : > { %1736 = vst [vmem:[%s3162_s7 + $0xe0] sm:$0xff] %v1704_v37  ;;  %v1705_v42 = vmax.f32 %v1665_v38, 0.0  ;;  %v2233_v47 = vadd.f32 %v2232_v46, %v2231_v43  ;;  %v2345_v6 = vadd.f32 %v2344_v40, %v2343_v58  ;;  %v2234_v48 = vpop.f32.mrb[94].mxu1  ;;  %v2346_v60 = vpop.f32.mrb[94].mxu0 }
 0x20a   : > { %v2235_v50 = vpop.f32.mrb[95].mxu1  ;;  %v2347_v52 = vpop.f32.mrb[95].mxu0 }
 0x20b   : > { %1737 = vst [vmem:[%s3162_s7 + $0xe8] sm:$0xff] %v1705_v42  ;;  %v1509_v0 = vadd.f32 %v2233_v47, %v3148_v15  ;;  %v2236_v53 = vadd.f32 %v2235_v50, %v2234_v48  ;;  %v2348_v54 = vadd.f32 %v2347_v52, %v2346_v60 }
 0x20d   : > { %v1670_v57 = vadd.f32 %v2345_v6, %v1509_v0  ;;  %v1512_v59 = vadd.f32 %v2236_v53, %v3153_v19 }
 0x20f   : > { %v1706_v62 = vmax.f32 %v1670_v57, 0.0  ;;  %v1673_v5 = vadd.f32 %v2348_v54, %v1512_v59 }
 0x211   : > { %1738 = vst [vmem:[%s3162_s7 + $0xf0] sm:$0xff] %v1706_v62  ;;  %v1707_v15 = vmax.f32 %v1673_v5, 0.0 }
 0x213   : > { %1739 = vst [vmem:[%s3162_s7 + $0xf8] sm:$0xff] %v1707_v15 }
 0x214   : > { %2710 = shalt.err (!%p2707_p5)
}
 0x215   : > { %s2711_s30 = scalar_lea.hbm %s3241_s6, 4096  ;;  %s2715_s20 = scalar_lea.hbm %s3297_s3, 8192 }
 0x216   : > { %p2712_p9 = scmp.ne.s32.totalorder %s3241_s6, %s2711_s30  ;;  %p2716_p3 = scmp.lt.u32.totalorder %s3241_s6, %s3297_s3 }
 0x217   : > { %p2717_p7 = scmp.lt.u32.totalorder %s2715_s20, %s2711_s30  ;;  %p2719_p4 = scmp.lt.u32.totalorder %s2711_s30, %s3241_s6 }
 0x218   : > { %p2713_p1 = pnand %p2712_p9, %p2906_p10 }
 0x219   : > { %p2718_p11 = por %p2717_p7, %p2716_p3 }
 0x21a   : > { %p2714_p2 = pneg %p2713_p1 }
 0x21b   : > { %p2720_p6 = por %p2719_p4, %p2718_p11 }
 0x21d   : > { %p2721_p8 = pnand %p2720_p6, %p2714_p2 }
 0x21f   : > { %2724 = shalt.err (!%p2721_p8)
}
 0x220   : > { %s2792_s7 = smov 128   ;;  %s2793_s8 = smov 8  }
 0x221   : > { %2374 = dma.vmem_to_hbm [thread:$0]  (%p2906_p10), %s3243_s10, 4096, %s3241_s6, %s1741_s9, %s2792_s7, %s2792_s7, %s2793_s8  }
 0x222 PF: > { %s1771_s11 = sand.u32 1, %s2763_s12   ;;  %p3314_p12 = scmp.ne.s32.totalorder %s3305_s23, 0 }
 0x223   : > { %p3315_p13 = scmp.ge.s32.totalorder %s2783_s17, 2  ;;  %s1772_s27 = scalar_lea.sflag [#allocation4], %s1771_s11 }
 0x225   : > { %p2385_p0 = pnand %p3315_p13, %p3314_p12 }
 0x227   : > { %2758 = dma.done.wait (!%p2385_p0), %s1772_s27, 4096  }
 0x228   : > { %2760 = vsyncadd (!%p2385_p0), %s1772_s27, 4294963200  ;;  %s20_s17 = sadd.s32 1, %s2783_s17   ;;  %s3316_s12 = smov %s2767_s13 }
 0x229   : > { %p17_p5 = scmp.ge.s32.totalorder %s20_s17, 4   ;;  %s3317_s13 = smov %s2771_s14 }
 0x22a   : > { %s3318_s14 = smov %s2915_s5  ;;  %s3319_s15 = smov %s2779_s16 }
 0x22b   : > { %s3320_s16 = smov %s3322_s28  ;;  %19 = sbr.rel (!%p17_p5) target bundleno = 7 (0x7), region = 81 }
 0x232   :  { %1777 = vsyncpa [#allocation3], 1 }
 0x233   :  { %1779 = vsyncpa [#allocation3 + $0x1], 1 }
 0x234   :  { %1780 = vsyncpa [#allocation6], 1 }
 0x235   :  { %1781 = vsyncpa [#allocation4], 1 }
 0x236   :  { %1783 = vsyncpa [#allocation4 + $0x1], 1 }

</bundles_post_ra>
